<compile_context>
chip_gen: v7x
topology: tpu7x:2x2x1
jax: 0.10.0
libtpu: 0.0.40
codegen_flags: <defaults>
</compile_context>

<pallas_src>
import math
import functools

import jax
import jax.numpy as jnp
from jax.experimental import pallas as pl
from jax.experimental.pallas import tpu as pltpu

# Weight storage / MXU input dtype.  bf16 halves weight HBM+VMEM traffic and
# doubles MXU rate on all gens (f32 accumulation kept).  Set to jnp.float32
# for bit-accurate parity tests against the PyTorch reference.
COMPUTE_DTYPE = jnp.bfloat16
VMEM_LIMIT = 64 * 1024 * 1024


def _mm(a, w):
    """(M,K) @ (K,N) on the MXU, f32 accumulation. Weights already COMPUTE_DTYPE."""
    return jnp.dot(a.astype(w.dtype), w, preferred_element_type=jnp.float32)


def _layernorm(x, w, b, eps=1e-5):
    mu = jnp.mean(x, axis=-1, keepdims=True)
    var = jnp.mean(jnp.square(x - mu), axis=-1, keepdims=True)
    return (x - mu) * jax.lax.rsqrt(var + eps) * w + b


# ---------------------------------------------------------------- kernels ---

def _encoder_layers_kernel(x_ref, pe_ref,
                           wqkv_ref, bqkv_ref, wo_ref, bo_ref,
                           w1_ref, b1_ref, w2_ref, b2_ref,
                           ln1w_ref, ln1b_ref, ln2w_ref, ln2b_ref,
                           out_ref, *, nhead, causal, scale_in):
    """One grid step = one encoder layer applied to a (Bb, S, D) batch block.

    Grid = (batch_blocks, nlayers); the output block index depends only on the
    batch axis, so the activation stays VMEM-resident across the layer axis
    (read-modify-write accumulator pattern).
    """
    # Fuse embedding scale + positional encoding into the first layer.
    @pl.when(pl.program_id(1) == 0)
    def _():
        out_ref[...] = x_ref[...] * scale_in + pe_ref[...][None, :, :]

    xb = out_ref[...]                          # (Bb, S, D) f32, previous layer
    Bb, S, D = xb.shape
    N = Bb * S
    Dh = D // nhead
    sm_scale = 1.0 / math.sqrt(Dh)

    x = xb.reshape(N, D)                       # batch folded into M

    # --- self attention: fused QKV projection over all B*S rows -------------
    qkv = _mm(x, wqkv_ref[0]) + bqkv_ref[0]            # (N, 3D) f32
    qkv = qkv.reshape(Bb, S, 3 * D)

    if causal:
        row = jax.lax.broadcasted_iota(jnp.int32, (S, S), 0)
        col = jax.lax.broadcasted_iota(jnp.int32, (S, S), 1)
        keep = (col <= row)[None, :, :]                # (1, S, S)

    # TODO(synk): flash-style KV tiling (online softmax) for S >= ~512, and a
    # lax.fori_loop over head groups when nhead is large (vreg live ranges).
    ctx = []
    for h in range(nhead):                     # static, small head loop
        lo = h * Dh
        qh = qkv[:, :, lo:lo + Dh]
        kh = qkv[:, :, D + lo:D + lo + Dh]
        vh = qkv[:, :, 2 * D + lo:2 * D + lo + Dh]
        s = jnp.einsum('bqd,bkd->bqk',
                       qh.astype(COMPUTE_DTYPE), kh.astype(COMPUTE_DTYPE),
                       preferred_element_type=jnp.float32) * sm_scale
        if causal:
            s = jnp.where(keep, s, -1e30)
        s = s - jnp.max(s, axis=-1, keepdims=True)
        p = jnp.exp(s)
        p = p * pl.reciprocal(jnp.sum(p, axis=-1, keepdims=True), approx=True)
        ctx.append(jnp.einsum('bqk,bkd->bqd',
                              p.astype(COMPUTE_DTYPE), vh.astype(COMPUTE_DTYPE),
                              preferred_element_type=jnp.float32))
    ctx = jnp.concatenate(ctx, axis=-1).reshape(N, D)   # (N, D)

    attn = _mm(ctx, wo_ref[0]) + bo_ref[0]

    # residual + LayerNorm 1 (post-norm, eps=1e-5), f32 statistics
    x = _layernorm(x + attn, ln1w_ref[0], ln1b_ref[0])

    # feed-forward (relu), weights pre-transposed, batch folded into M
    h1 = jnp.maximum(_mm(x, w1_ref[0]) + b1_ref[0], 0.0)
    y = _mm(h1, w2_ref[0]) + b2_ref[0]

    # residual + LayerNorm 2
    x = _layernorm(x + y, ln2w_ref[0], ln2b_ref[0])

    out_ref[...] = x.reshape(Bb, S, D)


def _decoder_logits_kernel(x_ref, wd_ref, bd_ref, logits_ref, logz_ref,
                           m_sc, l_sc):
    """Pass 1: per (seq-tile, vocab-tile) logits + online log-sum-exp stats."""
    vi = pl.program_id(1)
    nv = pl.num_programs(1)

    @pl.when(vi == 0)
    def _():
        m_sc[...] = jnp.full(m_sc.shape, -jnp.inf, jnp.float32)
        l_sc[...] = jnp.zeros(l_sc.shape, jnp.float32)

    B, ts, D = x_ref.shape
    N = B * ts
    x = x_ref[...].reshape(N, D)
    # one large-M matmul (batch folded), bias added once
    z = _mm(x, wd_ref[...]) + bd_ref[...]               # (N, Vt) f32

    # online log-sum-exp over vocab tiles
    m_new = jnp.maximum(m_sc[...], jnp.max(z, axis=-1, keepdims=True))
    l_sc[...] = (l_sc[...] * jnp.exp(m_sc[...] - m_new)
                 + jnp.sum(jnp.exp(z - m_new), axis=-1, keepdims=True))
    m_sc[...] = m_new

    # scatter rows into the PyTorch (seq, batch, vocab) output layout
    z3 = z.reshape(B, ts, z.shape[-1])
    for b in range(B):                         # static, small batch loop (store only)
        logits_ref[:, b, :] = z3[b]

    @pl.when(vi == nv - 1)
    def _():
        logz = (m_sc[...] + jnp.log(l_sc[...])).reshape(B, ts, 1)
        for b in range(B):
            logz_ref[:, b, :] = logz[b]


def _decoder_norm_kernel(logits_ref, logz_ref, out_ref):
    """Pass 2: log_softmax = logits - logZ, lane-dense vocab blocks."""
    out_ref[...] = logits_ref[...] - logz_ref[...]


# --------------------------------------------------------------- wrappers ---

def positional_encoding(max_len, d_model):
    position = jnp.arange(max_len, dtype=jnp.float32)[:, None]
    div_term = jnp.exp(jnp.arange(0, d_model, 2, dtype=jnp.float32)
                       * (-math.log(10000.0) / d_model))
    pe = jnp.zeros((max_len, d_model), jnp.float32)
    pe = pe.at[:, 0::2].set(jnp.sin(position * div_term))
    pe = pe.at[:, 1::2].set(jnp.cos(position * div_term))
    return pe


def _pick_tile(n, max_tile, multiple):
    if n <= max_tile:
        return n
    t = max_tile - (max_tile % multiple)
    while t >= multiple:
        if n % t == 0:
            return t
        t -= multiple
    return n  # TODO(synk): pad the axis when no aligned divisor exists


def encoder_stack(x, pe, params, *, nhead, causal, scale_in, b_block=None):
    """All nlayers in one pallas_call; activation VMEM-resident across layers."""
    B, S, D = x.shape
    L = params['wqkv_t'].shape[0]
    nhid = params['w1_t'].shape[2]
    if b_block is None:
        b_block = B           # fold the full batch into the matmul M dimension
    nb = B // b_block

    def wspec(shape):
        n = len(shape)
        return pl.BlockSpec((1,) + tuple(shape),
                            lambda b, l, _n=n: (l,) + (0,) * _n)

    # TODO(synk): on v7x with large D/nhid, single-buffer the constant x/pe
    # specs and the weight specs (pipeline_mode=pl.Buffered(1)) or fall back to
    # one pallas_call per layer so a single layer's bf16 weights fit 64 MiB.
    kernel = functools.partial(_encoder_layers_kernel, nhead=nhead,
                               causal=causal, scale_in=scale_in)
    return pl.pallas_call(
        kernel,
        out_shape=jax.ShapeDtypeStruct((B, S, D), jnp.float32),
        grid=(nb, L),
        in_specs=[
            pl.BlockSpec((b_block, S, D), lambda b, l: (b, 0, 0)),
            pl.BlockSpec((S, D), lambda b, l: (0, 0)),
            wspec((D, 3 * D)), wspec((1, 3 * D)),
            wspec((D, D)), wspec((1, D)),
            wspec((D, nhid)), wspec((1, nhid)),
            wspec((nhid, D)), wspec((1, D)),
            wspec((1, D)), wspec((1, D)), wspec((1, D)), wspec((1, D)),
        ],
        out_specs=pl.BlockSpec((b_block, S, D), lambda b, l: (b, 0, 0)),
        compiler_params=pltpu.CompilerParams(
            dimension_semantics=("parallel", "arbitrary"),
            vmem_limit_bytes=VMEM_LIMIT),
    )(x, pe, params['wqkv_t'], params['bqkv'], params['wo_t'], params['bo'],
      params['w1_t'], params['b1'], params['w2_t'], params['b2'],
      params['ln1w'], params['ln1b'], params['ln2w'], params['ln2b'])


def decode_logprobs(x, dec_w_t, dec_b):
    """Linear decoder + log_softmax, tiled over (seq tiles, vocab tiles)."""
    B, S, D = x.shape
    V = dec_w_t.shape[1]
    ts = _pick_tile(S, 128, 8)
    vt = _pick_tile(V, 2048, 128)
    n_s, n_v = S // ts, V // vt

    logits, logz = pl.pallas_call(
        _decoder_logits_kernel,
        out_shape=(jax.ShapeDtypeStruct((S, B, V), jnp.float32),
                   jax.ShapeDtypeStruct((S, B, 1), jnp.float32)),
        grid=(n_s, n_v),
        in_specs=[pl.BlockSpec((B, ts, D), lambda si, vi: (0, si, 0)),
                  pl.BlockSpec((D, vt), lambda si, vi: (0, vi)),
                  pl.BlockSpec((1, vt), lambda si, vi: (0, vi))],
        out_specs=(pl.BlockSpec((ts, B, vt), lambda si, vi: (si, 0, vi)),
                   pl.BlockSpec((ts, B, 1), lambda si, vi: (si, 0, 0))),
        scratch_shapes=[pltpu.VMEM((B * ts, 1), jnp.float32),
                        pltpu.VMEM((B * ts, 1), jnp.float32)],
        compiler_params=pltpu.CompilerParams(
            dimension_semantics=("parallel", "arbitrary"),
            vmem_limit_bytes=VMEM_LIMIT),
    )(x, dec_w_t, dec_b)

    logp = pl.pallas_call(
        _decoder_norm_kernel,
        out_shape=jax.ShapeDtypeStruct((S, B, V), jnp.float32),
        grid=(n_s, n_v),
        in_specs=[pl.BlockSpec((ts, B, vt), lambda si, vi: (si, 0, vi)),
                  pl.BlockSpec((ts, B, 1), lambda si, vi: (si, 0, 0))],
        out_specs=pl.BlockSpec((ts, B, vt), lambda si, vi: (si, 0, vi)),
        compiler_params=pltpu.CompilerParams(
            dimension_semantics=("parallel", "parallel"),
            vmem_limit_bytes=VMEM_LIMIT),
    )(logits, logz)
    return logp


def transformer_forward(params, src, *, nhead, has_mask=True):
    # src: (S, B) int32 token ids
    S, B = src.shape
    V, D = params['emb'].shape

    # Embedding row gather (no one-hot matmul); transposing the tiny (S,B) int
    # ids yields a (B,S,D) activation layout directly, so no activation-sized
    # transpose is ever materialized in HBM.
    emb_rows = jnp.take(params['emb'], src.T, axis=0)       # (B, S, D) f32
    pe = positional_encoding(S, D)                          # (S, D)

    # TODO(synk): dropout (p=0.5) layers are omitted — eval/inference semantics.
    x = encoder_stack(emb_rows, pe, params, nhead=nhead, causal=has_mask,
                      scale_in=math.sqrt(D))

    return decode_logprobs(x, params['dec_w_t'], params['dec_b'])  # (S, B, V)


# ------------------------------------------------------------------ params ---

def init_params(key, ntoken, ninp, nhead, nhid, nlayers):
    keys = jax.random.split(key, 2 + nlayers)
    initrange = 0.1
    emb = jax.random.uniform(keys[0], (ntoken, ninp), jnp.float32,
                             -initrange, initrange)
    dec_w_t = jax.random.uniform(keys[1], (ntoken, ninp), jnp.float32,
                                 -initrange, initrange).T       # (D, V)

    wqkv_t, wo_t, w1_t, w2_t = [], [], [], []
    for l in range(nlayers):
        lk = jax.random.split(keys[2 + l], 4)
        wqkv_t.append(jax.random.uniform(lk[0], (3 * ninp, ninp), jnp.float32,
                                         -initrange, initrange).T)  # (D, 3D)
        wo_t.append(jax.random.uniform(lk[1], (ninp, ninp), jnp.float32,
                                       -initrange, initrange).T)    # (D, D)
        w1_t.append(jax.random.uniform(lk[2], (nhid, ninp), jnp.float32,
                                       -initrange, initrange).T)    # (D, nhid)
        w2_t.append(jax.random.uniform(lk[3], (ninp, nhid), jnp.float32,
                                       -initrange, initrange).T)    # (nhid, D)

    L = nlayers
    return {
        'emb': emb,
        'dec_w_t': dec_w_t.astype(COMPUTE_DTYPE),
        'dec_b': jnp.zeros((1, ntoken), jnp.float32),
        # per-layer weights stacked with a leading L dim, matmul weights bf16
        'wqkv_t': jnp.stack(wqkv_t).astype(COMPUTE_DTYPE),   # (L, D, 3D)
        'bqkv': jnp.zeros((L, 1, 3 * ninp), jnp.float32),
        'wo_t': jnp.stack(wo_t).astype(COMPUTE_DTYPE),       # (L, D, D)
        'bo': jnp.zeros((L, 1, ninp), jnp.float32),
        'w1_t': jnp.stack(w1_t).astype(COMPUTE_DTYPE),       # (L, D, nhid)
        'b1': jnp.zeros((L, 1, nhid), jnp.float32),
        'w2_t': jnp.stack(w2_t).astype(COMPUTE_DTYPE),       # (L, nhid, D)
        'b2': jnp.zeros((L, 1, ninp), jnp.float32),
        'ln1w': jnp.ones((L, 1, ninp), jnp.float32),
        'ln1b': jnp.zeros((L, 1, ninp), jnp.float32),
        'ln2w': jnp.ones((L, 1, ninp), jnp.float32),
        'ln2b': jnp.zeros((L, 1, ninp), jnp.float32),
    }


# -------------------------------------------------------------------- main ---

if __name__ == "__main__":
    ntoken, ninp, nhead, nhid, nlayers = 32, 32, 2, 64, 2
    d0, d1 = 4, 4  # constructor args, unused in forward (as in the PyTorch module)
    seq_len, batch = 8, 2

    key = jax.random.PRNGKey(0)
    pkey, skey = jax.random.split(key)
    params = init_params(pkey, ntoken, ninp, nhead, nhid, nlayers)
    src = jax.random.randint(skey, (seq_len, batch), 0, ntoken, dtype=jnp.int32)

    fwd = jax.jit(functools.partial(transformer_forward, nhead=nhead,
                                    has_mask=True))
    out = jax.block_until_ready(fwd(params, src))

    assert out.shape == (seq_len, batch, ntoken)
    assert bool(jnp.all(jnp.isfinite(out)))
    # log_softmax rows must exponentiate-sum to 1
    assert bool(jnp.allclose(jnp.sum(jnp.exp(out), axis=-1), 1.0, atol=1e-3))
    print("KERNEL_OK")
</pallas_src>

<mosaic_0001>
module attributes {stable_mosaic.version = 11 : i64} {
  func.func @_encoder_layers_kernel(%arg0: i32, %arg1: i32, %arg2: memref<2x8x32xf32, #tpu.memory_space<vmem>>, %arg3: memref<8x32xf32, #tpu.memory_space<vmem>>, %arg4: memref<1x32x96xbf16, #tpu.memory_space<vmem>>, %arg5: memref<1x1x96xf32, #tpu.memory_space<vmem>>, %arg6: memref<1x32x32xbf16, #tpu.memory_space<vmem>>, %arg7: memref<1x1x32xf32, #tpu.memory_space<vmem>>, %arg8: memref<1x32x64xbf16, #tpu.memory_space<vmem>>, %arg9: memref<1x1x64xf32, #tpu.memory_space<vmem>>, %arg10: memref<1x64x32xbf16, #tpu.memory_space<vmem>>, %arg11: memref<1x1x32xf32, #tpu.memory_space<vmem>>, %arg12: memref<1x1x32xf32, #tpu.memory_space<vmem>>, %arg13: memref<1x1x32xf32, #tpu.memory_space<vmem>>, %arg14: memref<1x1x32xf32, #tpu.memory_space<vmem>>, %arg15: memref<1x1x32xf32, #tpu.memory_space<vmem>>, %arg16: memref<2x8x32xf32, #tpu.memory_space<vmem>>) attributes {dimension_semantics = [#tpu.dimension_semantics<parallel>, #tpu.dimension_semantics<arbitrary>], iteration_bounds = array<i64: 1, 2>, scalar_prefetch = 0 : i64, scratch_operands = 0 : i64, tpu.core_type = #tpu.core_type<tc>, window_params = [{transform_indices = @transform_0, window_bounds = array<i64: 2, 8, 32>}, {pipeline_mode = #tpu.pipeline_mode<synchronous>, transform_indices = @transform_1, window_bounds = array<i64: 8, 32>}, {transform_indices = @transform_2, window_bounds = array<i64: 1, 32, 96>}, {transform_indices = @transform_3, window_bounds = array<i64: 1, 1, 96>}, {transform_indices = @transform_4, window_bounds = array<i64: 1, 32, 32>}, {transform_indices = @transform_5, window_bounds = array<i64: 1, 1, 32>}, {transform_indices = @transform_6, window_bounds = array<i64: 1, 32, 64>}, {transform_indices = @transform_7, window_bounds = array<i64: 1, 1, 64>}, {transform_indices = @transform_8, window_bounds = array<i64: 1, 64, 32>}, {transform_indices = @transform_9, window_bounds = array<i64: 1, 1, 32>}, {transform_indices = @transform_10, window_bounds = array<i64: 1, 1, 32>}, {transform_indices = @transform_11, window_bounds = array<i64: 1, 1, 32>}, {transform_indices = @transform_12, window_bounds = array<i64: 1, 1, 32>}, {transform_indices = @transform_13, window_bounds = array<i64: 1, 1, 32>}, {transform_indices = @transform_14, window_bounds = array<i64: 2, 8, 32>}]} {
    %c0_i32 = arith.constant 0 : i32
    %0 = arith.cmpi eq, %arg1, %c0_i32 : i32
    %1 = arith.extui %0 : i1 to i32
    %c0_i32_0 = arith.constant 0 : i32
    %2 = arith.cmpi ne, %1, %c0_i32_0 : i32
    scf.if %2 {
      %c0_68 = arith.constant 0 : index
      %c0_69 = arith.constant 0 : index
      %c0_70 = arith.constant 0 : index
      %152 = vector.load %arg2[%c0_68, %c0_69, %c0_70] : memref<2x8x32xf32, #tpu.memory_space<vmem>>, vector<2x8x32xf32>
      %cst_71 = arith.constant 5.65685415 : f32
      %153 = vector.broadcast %cst_71 : f32 to vector<2x8x32xf32>
      %154 = arith.mulf %152, %153 : vector<2x8x32xf32>
      %c0_72 = arith.constant 0 : index
      %c0_73 = arith.constant 0 : index
      %155 = vector.load %arg3[%c0_72, %c0_73] : memref<8x32xf32, #tpu.memory_space<vmem>>, vector<8x32xf32>
      %156 = vector.shape_cast %155 : vector<8x32xf32> to vector<1x8x32xf32>
      %157 = vector.broadcast %156 : vector<1x8x32xf32> to vector<2x8x32xf32>
      %158 = arith.addf %154, %157 : vector<2x8x32xf32>
      %c0_74 = arith.constant 0 : index
      %c0_75 = arith.constant 0 : index
      %c0_76 = arith.constant 0 : index
      %159 = vector.load %arg16[%c0_74, %c0_75, %c0_76] : memref<2x8x32xf32, #tpu.memory_space<vmem>>, vector<2x8x32xf32>
      tpu.vector_store %arg16[%c0_74, %c0_75, %c0_76], %158 {strides = array<i32>} : memref<2x8x32xf32, #tpu.memory_space<vmem>>, vector<2x8x32xf32>,
    } else {
    }
    %c0 = arith.constant 0 : index
    %c0_1 = arith.constant 0 : index
    %c0_2 = arith.constant 0 : index
    %3 = vector.load %arg16[%c0, %c0_1, %c0_2] : memref<2x8x32xf32, #tpu.memory_space<vmem>>, vector<2x8x32xf32>
    %4 = vector.shape_cast %3 : vector<2x8x32xf32> to vector<16x32xf32>
    %c0_3 = arith.constant 0 : index
    %c0_4 = arith.constant 0 : index
    %c0_5 = arith.constant 0 : index
    %5 = vector.load %arg4[%c0_3, %c0_4, %c0_5] : memref<1x32x96xbf16, #tpu.memory_space<vmem>>, vector<1x32x96xbf16>
    %6 = vector.shape_cast %5 : vector<1x32x96xbf16> to vector<32x96xbf16>
    %7 = arith.truncf %4 : vector<16x32xf32> to vector<16x32xbf16>
    %cst = arith.constant dense<0.000000e+00> : vector<16x96xf32>
    %8 = tpu.matmul %7, %6, %cst {dimension_numbers = #tpu.dot_dimension_numbers<[1], [0], [0], [1], [0, 0, 1, 1], [], []>} : vector<16x32xbf16>, vector<32x96xbf16>, vector<16x96xf32> -> vector<16x96xf32>
    %c0_6 = arith.constant 0 : index
    %c0_7 = arith.constant 0 : index
    %c0_8 = arith.constant 0 : index
    %9 = vector.load %arg5[%c0_6, %c0_7, %c0_8] : memref<1x1x96xf32, #tpu.memory_space<vmem>>, vector<1x1x96xf32>
    %10 = vector.shape_cast %9 : vector<1x1x96xf32> to vector<1x96xf32>
    %11 = vector.broadcast %10 : vector<1x96xf32> to vector<16x96xf32>
    %12 = arith.addf %8, %11 : vector<16x96xf32>
    %13 = vector.shape_cast %12 : vector<16x96xf32> to vector<2x8x96xf32>
    %14 = tpu.iota {dimensions = array<i32: 0>} : vector<8x8xi32>
    %15 = tpu.iota {dimensions = array<i32: 1>} : vector<8x8xi32>
    %16 = arith.cmpi sle, %15, %14 : vector<8x8xi32>
    %17 = vector.shape_cast %16 : vector<8x8xi1> to vector<1x8x8xi1>
    %18 = vector.extract_strided_slice %13 {offsets = [0, 0, 0], sizes = [2, 8, 16], strides = [1, 1, 1]} : vector<2x8x96xf32> to vector<2x8x16xf32>
    %19 = vector.extract_strided_slice %13 {offsets = [0, 0, 32], sizes = [2, 8, 16], strides = [1, 1, 1]} : vector<2x8x96xf32> to vector<2x8x16xf32>
    %20 = vector.extract_strided_slice %13 {offsets = [0, 0, 64], sizes = [2, 8, 16], strides = [1, 1, 1]} : vector<2x8x96xf32> to vector<2x8x16xf32>
    %21 = arith.truncf %18 : vector<2x8x16xf32> to vector<2x8x16xbf16>
    %22 = arith.truncf %19 : vector<2x8x16xf32> to vector<2x8x16xbf16>
    "tpu.trace_start"() <{level = 10 : i32, message = "bqd,bkd->bqk"}> : () -> ()
    %cst_9 = arith.constant dense<0.000000e+00> : vector<2x8x8xf32>
    %23 = tpu.matmul %21, %22, %cst_9 {dimension_numbers = #tpu.dot_dimension_numbers<[2], [2], [1], [1], [0, 0, 0, 1, 1, 1], [0], [0]>} : vector<2x8x16xbf16>, vector<2x8x16xbf16>, vector<2x8x8xf32> -> vector<2x8x8xf32>
    "tpu.trace_stop"() : () -> ()
    %cst_10 = arith.constant 2.500000e-01 : f32
    %24 = vector.broadcast %cst_10 : f32 to vector<2x8x8xf32>
    %25 = arith.mulf %23, %24 : vector<2x8x8xf32>
    %cst_11 = arith.constant -1.000000e+30 : f32
    %26 = vector.shape_cast %17 : vector<1x8x8xi1> to vector<1x8x8xi1>
    %27 = vector.broadcast %26 : vector<1x8x8xi1> to vector<2x8x8xi1>
    %28 = vector.broadcast %cst_11 : f32 to vector<2x8x8xf32>
    %29 = arith.select %27, %25, %28 : vector<2x8x8xi1>, vector<2x8x8xf32>
    %cst_12 = arith.constant dense<0xFF800000> : vector<2x8xf32>
    %30 = vector.multi_reduction <maximumf>, %29, %cst_12 [2] : vector<2x8x8xf32> to vector<2x8xf32>
    %31 = vector.shape_cast %30 : vector<2x8xf32> to vector<2x8x1xf32>
    %32 = vector.broadcast %31 : vector<2x8x1xf32> to vector<2x8x8xf32>
    %33 = arith.subf %29, %32 : vector<2x8x8xf32>
    %34 = math.exp %33 : vector<2x8x8xf32>
    %cst_13 = arith.constant dense<0.000000e+00> : vector<2x8xf32>
    %35 = vector.multi_reduction <add>, %34, %cst_13 [2] : vector<2x8x8xf32> to vector<2x8xf32>
    %36 = vector.shape_cast %35 : vector<2x8xf32> to vector<2x8x1xf32>
    %37 = tpu.reciprocal %36 {approx = true} : vector<2x8x1xf32> -> vector<2x8x1xf32>
    %38 = vector.broadcast %37 : vector<2x8x1xf32> to vector<2x8x8xf32>
    %39 = arith.mulf %34, %38 : vector<2x8x8xf32>
    %40 = arith.truncf %39 : vector<2x8x8xf32> to vector<2x8x8xbf16>
    %41 = arith.truncf %20 : vector<2x8x16xf32> to vector<2x8x16xbf16>
    "tpu.trace_start"() <{level = 10 : i32, message = "bqk,bkd->bqd"}> : () -> ()
    %cst_14 = arith.constant dense<0.000000e+00> : vector<2x8x16xf32>
    %42 = tpu.matmul %40, %41, %cst_14 {dimension_numbers = #tpu.dot_dimension_numbers<[2], [1], [1], [2], [0, 0, 0, 1, 1, 2], [0], [0]>} : vector<2x8x8xbf16>, vector<2x8x16xbf16>, vector<2x8x16xf32> -> vector<2x8x16xf32>
    "tpu.trace_stop"() : () -> ()
    %43 = vector.extract_strided_slice %13 {offsets = [0, 0, 16], sizes = [2, 8, 16], strides = [1, 1, 1]} : vector<2x8x96xf32> to vector<2x8x16xf32>
    %44 = vector.extract_strided_slice %13 {offsets = [0, 0, 48], sizes = [2, 8, 16], strides = [1, 1, 1]} : vector<2x8x96xf32> to vector<2x8x16xf32>
    %45 = vector.extract_strided_slice %13 {offsets = [0, 0, 80], sizes = [2, 8, 16], strides = [1, 1, 1]} : vector<2x8x96xf32> to vector<2x8x16xf32>
    %46 = arith.truncf %43 : vector<2x8x16xf32> to vector<2x8x16xbf16>
    %47 = arith.truncf %44 : vector<2x8x16xf32> to vector<2x8x16xbf16>
    "tpu.trace_start"() <{level = 10 : i32, message = "bqd,bkd->bqk"}> : () -> ()
    %cst_15 = arith.constant dense<0.000000e+00> : vector<2x8x8xf32>
    %48 = tpu.matmul %46, %47, %cst_15 {dimension_numbers = #tpu.dot_dimension_numbers<[2], [2], [1], [1], [0, 0, 0, 1, 1, 1], [0], [0]>} : vector<2x8x16xbf16>, vector<2x8x16xbf16>, vector<2x8x8xf32> -> vector<2x8x8xf32>
    "tpu.trace_stop"() : () -> ()
    %cst_16 = arith.constant 2.500000e-01 : f32
    %49 = vector.broadcast %cst_16 : f32 to vector<2x8x8xf32>
    %50 = arith.mulf %48, %49 : vector<2x8x8xf32>
    %cst_17 = arith.constant -1.000000e+30 : f32
    %51 = vector.shape_cast %17 : vector<1x8x8xi1> to vector<1x8x8xi1>
    %52 = vector.broadcast %51 : vector<1x8x8xi1> to vector<2x8x8xi1>
    %53 = vector.broadcast %cst_17 : f32 to vector<2x8x8xf32>
    %54 = arith.select %52, %50, %53 : vector<2x8x8xi1>, vector<2x8x8xf32>
    %cst_18 = arith.constant dense<0xFF800000> : vector<2x8xf32>
    %55 = vector.multi_reduction <maximumf>, %54, %cst_18 [2] : vector<2x8x8xf32> to vector<2x8xf32>
    %56 = vector.shape_cast %55 : vector<2x8xf32> to vector<2x8x1xf32>
    %57 = vector.broadcast %56 : vector<2x8x1xf32> to vector<2x8x8xf32>
    %58 = arith.subf %54, %57 : vector<2x8x8xf32>
    %59 = math.exp %58 : vector<2x8x8xf32>
    %cst_19 = arith.constant dense<0.000000e+00> : vector<2x8xf32>
    %60 = vector.multi_reduction <add>, %59, %cst_19 [2] : vector<2x8x8xf32> to vector<2x8xf32>
    %61 = vector.shape_cast %60 : vector<2x8xf32> to vector<2x8x1xf32>
    %62 = tpu.reciprocal %61 {approx = true} : vector<2x8x1xf32> -> vector<2x8x1xf32>
    %63 = vector.broadcast %62 : vector<2x8x1xf32> to vector<2x8x8xf32>
    %64 = arith.mulf %59, %63 : vector<2x8x8xf32>
    %65 = arith.truncf %64 : vector<2x8x8xf32> to vector<2x8x8xbf16>
    %66 = arith.truncf %45 : vector<2x8x16xf32> to vector<2x8x16xbf16>
    "tpu.trace_start"() <{level = 10 : i32, message = "bqk,bkd->bqd"}> : () -> ()
    %cst_20 = arith.constant dense<0.000000e+00> : vector<2x8x16xf32>
    %67 = tpu.matmul %65, %66, %cst_20 {dimension_numbers = #tpu.dot_dimension_numbers<[2], [1], [1], [2], [0, 0, 0, 1, 1, 2], [0], [0]>} : vector<2x8x8xbf16>, vector<2x8x16xbf16>, vector<2x8x16xf32> -> vector<2x8x16xf32>
    "tpu.trace_stop"() : () -> ()
    %68 = tpu.concatenate %42, %67 in 2 : vector<2x8x16xf32>, vector<2x8x16xf32> -> vector<2x8x32xf32>
    %69 = vector.shape_cast %68 : vector<2x8x32xf32> to vector<16x32xf32>
    %c0_21 = arith.constant 0 : index
    %c0_22 = arith.constant 0 : index
    %c0_23 = arith.constant 0 : index
    %70 = vector.load %arg6[%c0_21, %c0_22, %c0_23] : memref<1x32x32xbf16, #tpu.memory_space<vmem>>, vector<1x32x32xbf16>
    %71 = vector.shape_cast %70 : vector<1x32x32xbf16> to vector<32x32xbf16>
    %72 = arith.truncf %69 : vector<16x32xf32> to vector<16x32xbf16>
    %cst_24 = arith.constant dense<0.000000e+00> : vector<16x32xf32>
    %73 = tpu.matmul %72, %71, %cst_24 {dimension_numbers = #tpu.dot_dimension_numbers<[1], [0], [0], [1], [0, 0, 1, 1], [], []>} : vector<16x32xbf16>, vector<32x32xbf16>, vector<16x32xf32> -> vector<16x32xf32>
    %c0_25 = arith.constant 0 : index
    %c0_26 = arith.constant 0 : index
    %c0_27 = arith.constant 0 : index
    %74 = vector.load %arg7[%c0_25, %c0_26, %c0_27] : memref<1x1x32xf32, #tpu.memory_space<vmem>>, vector<1x1x32xf32>
    %75 = vector.shape_cast %74 : vector<1x1x32xf32> to vector<1x32xf32>
    %76 = vector.broadcast %75 : vector<1x32xf32> to vector<16x32xf32>
    %77 = arith.addf %73, %76 : vector<16x32xf32>
    %78 = arith.addf %4, %77 : vector<16x32xf32>
    %c0_28 = arith.constant 0 : index
    %c0_29 = arith.constant 0 : index
    %c0_30 = arith.constant 0 : index
    %79 = vector.load %arg12[%c0_28, %c0_29, %c0_30] : memref<1x1x32xf32, #tpu.memory_space<vmem>>, vector<1x1x32xf32>
    %80 = vector.shape_cast %79 : vector<1x1x32xf32> to vector<1x32xf32>
    %c0_31 = arith.constant 0 : index
    %c0_32 = arith.constant 0 : index
    %c0_33 = arith.constant 0 : index
    %81 = vector.load %arg13[%c0_31, %c0_32, %c0_33] : memref<1x1x32xf32, #tpu.memory_space<vmem>>, vector<1x1x32xf32>
    %82 = vector.shape_cast %81 : vector<1x1x32xf32> to vector<1x32xf32>
    %cst_34 = arith.constant dense<0.000000e+00> : vector<16xf32>
    %83 = vector.multi_reduction <add>, %78, %cst_34 [1] : vector<16x32xf32> to vector<16xf32>
    %84 = vector.shape_cast %83 : vector<16xf32> to vector<16x1xf32>
    %cst_35 = arith.constant 3.200000e+01 : f32
    %85 = vector.broadcast %cst_35 : f32 to vector<16x1xf32>
    %86 = arith.divf %84, %85 : vector<16x1xf32>
    %87 = vector.broadcast %86 : vector<16x1xf32> to vector<16x32xf32>
    %88 = arith.subf %78, %87 : vector<16x32xf32>
    %89 = arith.mulf %88, %88 : vector<16x32xf32>
    %cst_36 = arith.constant dense<0.000000e+00> : vector<16xf32>
    %90 = vector.multi_reduction <add>, %89, %cst_36 [1] : vector<16x32xf32> to vector<16xf32>
    %91 = vector.shape_cast %90 : vector<16xf32> to vector<16x1xf32>
    %cst_37 = arith.constant 3.200000e+01 : f32
    %92 = vector.broadcast %cst_37 : f32 to vector<16x1xf32>
    %93 = arith.divf %91, %92 : vector<16x1xf32>
    %94 = vector.broadcast %86 : vector<16x1xf32> to vector<16x32xf32>
    %95 = arith.subf %78, %94 : vector<16x32xf32>
    %cst_38 = arith.constant 9.99999974E-6 : f32
    %96 = vector.broadcast %cst_38 : f32 to vector<16x1xf32>
    %97 = arith.addf %93, %96 : vector<16x1xf32>
    %98 = math.rsqrt %97 : vector<16x1xf32>
    %99 = vector.broadcast %98 : vector<16x1xf32> to vector<16x32xf32>
    %100 = arith.mulf %95, %99 : vector<16x32xf32>
    %101 = vector.broadcast %80 : vector<1x32xf32> to vector<16x32xf32>
    %102 = arith.mulf %100, %101 : vector<16x32xf32>
    %103 = vector.broadcast %82 : vector<1x32xf32> to vector<16x32xf32>
    %104 = arith.addf %102, %103 : vector<16x32xf32>
    %c0_39 = arith.constant 0 : index
    %c0_40 = arith.constant 0 : index
    %c0_41 = arith.constant 0 : index
    %105 = vector.load %arg8[%c0_39, %c0_40, %c0_41] : memref<1x32x64xbf16, #tpu.memory_space<vmem>>, vector<1x32x64xbf16>
    %106 = vector.shape_cast %105 : vector<1x32x64xbf16> to vector<32x64xbf16>
    %107 = arith.truncf %104 : vector<16x32xf32> to vector<16x32xbf16>
    %cst_42 = arith.constant dense<0.000000e+00> : vector<16x64xf32>
    %108 = tpu.matmul %107, %106, %cst_42 {dimension_numbers = #tpu.dot_dimension_numbers<[1], [0], [0], [1], [0, 0, 1, 1], [], []>} : vector<16x32xbf16>, vector<32x64xbf16>, vector<16x64xf32> -> vector<16x64xf32>
    %c0_43 = arith.constant 0 : index
    %c0_44 = arith.constant 0 : index
    %c0_45 = arith.constant 0 : index
    %109 = vector.load %arg9[%c0_43, %c0_44, %c0_45] : memref<1x1x64xf32, #tpu.memory_space<vmem>>, vector<1x1x64xf32>
    %110 = vector.shape_cast %109 : vector<1x1x64xf32> to vector<1x64xf32>
    %111 = vector.broadcast %110 : vector<1x64xf32> to vector<16x64xf32>
    %112 = arith.addf %108, %111 : vector<16x64xf32>
    %cst_46 = arith.constant 0.000000e+00 : f32
    %113 = vector.broadcast %cst_46 : f32 to vector<16x64xf32>
    %114 = arith.maximumf %112, %113 : vector<16x64xf32>
    %c0_47 = arith.constant 0 : index
    %c0_48 = arith.constant 0 : index
    %c0_49 = arith.constant 0 : index
    %115 = vector.load %arg10[%c0_47, %c0_48, %c0_49] : memref<1x64x32xbf16, #tpu.memory_space<vmem>>, vector<1x64x32xbf16>
    %116 = vector.shape_cast %115 : vector<1x64x32xbf16> to vector<64x32xbf16>
    %117 = arith.truncf %114 : vector<16x64xf32> to vector<16x64xbf16>
    %cst_50 = arith.constant dense<0.000000e+00> : vector<16x32xf32>
    %118 = tpu.matmul %117, %116, %cst_50 {dimension_numbers = #tpu.dot_dimension_numbers<[1], [0], [0], [1], [0, 0, 1, 1], [], []>} : vector<16x64xbf16>, vector<64x32xbf16>, vector<16x32xf32> -> vector<16x32xf32>
    %c0_51 = arith.constant 0 : index
    %c0_52 = arith.constant 0 : index
    %c0_53 = arith.constant 0 : index
    %119 = vector.load %arg11[%c0_51, %c0_52, %c0_53] : memref<1x1x32xf32, #tpu.memory_space<vmem>>, vector<1x1x32xf32>
    %120 = vector.shape_cast %119 : vector<1x1x32xf32> to vector<1x32xf32>
    %121 = vector.broadcast %120 : vector<1x32xf32> to vector<16x32xf32>
    %122 = arith.addf %118, %121 : vector<16x32xf32>
    %123 = arith.addf %104, %122 : vector<16x32xf32>
    %c0_54 = arith.constant 0 : index
    %c0_55 = arith.constant 0 : index
    %c0_56 = arith.constant 0 : index
    %124 = vector.load %arg14[%c0_54, %c0_55, %c0_56] : memref<1x1x32xf32, #tpu.memory_space<vmem>>, vector<1x1x32xf32>
    %125 = vector.shape_cast %124 : vector<1x1x32xf32> to vector<1x32xf32>
    %c0_57 = arith.constant 0 : index
    %c0_58 = arith.constant 0 : index
    %c0_59 = arith.constant 0 : index
    %126 = vector.load %arg15[%c0_57, %c0_58, %c0_59] : memref<1x1x32xf32, #tpu.memory_space<vmem>>, vector<1x1x32xf32>
    %127 = vector.shape_cast %126 : vector<1x1x32xf32> to vector<1x32xf32>
    %cst_60 = arith.constant dense<0.000000e+00> : vector<16xf32>
    %128 = vector.multi_reduction <add>, %123, %cst_60 [1] : vector<16x32xf32> to vector<16xf32>
    %129 = vector.shape_cast %128 : vector<16xf32> to vector<16x1xf32>
    %cst_61 = arith.constant 3.200000e+01 : f32
    %130 = vector.broadcast %cst_61 : f32 to vector<16x1xf32>
    %131 = arith.divf %129, %130 : vector<16x1xf32>
    %132 = vector.broadcast %131 : vector<16x1xf32> to vector<16x32xf32>
    %133 = arith.subf %123, %132 : vector<16x32xf32>
    %134 = arith.mulf %133, %133 : vector<16x32xf32>
    %cst_62 = arith.constant dense<0.000000e+00> : vector<16xf32>
    %135 = vector.multi_reduction <add>, %134, %cst_62 [1] : vector<16x32xf32> to vector<16xf32>
    %136 = vector.shape_cast %135 : vector<16xf32> to vector<16x1xf32>
    %cst_63 = arith.constant 3.200000e+01 : f32
    %137 = vector.broadcast %cst_63 : f32 to vector<16x1xf32>
    %138 = arith.divf %136, %137 : vector<16x1xf32>
    %139 = vector.broadcast %131 : vector<16x1xf32> to vector<16x32xf32>
    %140 = arith.subf %123, %139 : vector<16x32xf32>
    %cst_64 = arith.constant 9.99999974E-6 : f32
    %141 = vector.broadcast %cst_64 : f32 to vector<16x1xf32>
    %142 = arith.addf %138, %141 : vector<16x1xf32>
    %143 = math.rsqrt %142 : vector<16x1xf32>
    %144 = vector.broadcast %143 : vector<16x1xf32> to vector<16x32xf32>
    %145 = arith.mulf %140, %144 : vector<16x32xf32>
    %146 = vector.broadcast %125 : vector<1x32xf32> to vector<16x32xf32>
    %147 = arith.mulf %145, %146 : vector<16x32xf32>
    %148 = vector.broadcast %127 : vector<1x32xf32> to vector<16x32xf32>
    %149 = arith.addf %147, %148 : vector<16x32xf32>
    %150 = vector.shape_cast %149 : vector<16x32xf32> to vector<2x8x32xf32>
    %c0_65 = arith.constant 0 : index
    %c0_66 = arith.constant 0 : index
    %c0_67 = arith.constant 0 : index
    %151 = vector.load %arg16[%c0_65, %c0_66, %c0_67] : memref<2x8x32xf32, #tpu.memory_space<vmem>>, vector<2x8x32xf32>
    tpu.vector_store %arg16[%c0_65, %c0_66, %c0_67], %150 {strides = array<i32>} : memref<2x8x32xf32, #tpu.memory_space<vmem>>, vector<2x8x32xf32>,
    return
  }
  func.func @transform_0(%arg0: i32, %arg1: i32) -> (i32, i32, i32) {
    %c0_i32 = arith.constant 0 : i32
    %c0_i32_0 = arith.constant 0 : i32
    %c0_i32_1 = arith.constant 0 : i32
    return %arg0, %c0_i32, %c0_i32_0 : i32, i32, i32
  }
  func.func @transform_1(%arg0: i32, %arg1: i32) -> (i32, i32) {
    %c0_i32 = arith.constant 0 : i32
    %c0_i32_0 = arith.constant 0 : i32
    %c0_i32_1 = arith.constant 0 : i32
    return %c0_i32, %c0_i32_0 : i32, i32
  }
  func.func @transform_2(%arg0: i32, %arg1: i32) -> (i32, i32, i32) {
    %c0_i32 = arith.constant 0 : i32
    %c0_i32_0 = arith.constant 0 : i32
    %c0_i32_1 = arith.constant 0 : i32
    return %arg1, %c0_i32, %c0_i32_0 : i32, i32, i32
  }
  func.func @transform_3(%arg0: i32, %arg1: i32) -> (i32, i32, i32) {
    %c0_i32 = arith.constant 0 : i32
    %c0_i32_0 = arith.constant 0 : i32
    %c0_i32_1 = arith.constant 0 : i32
    return %arg1, %c0_i32, %c0_i32_0 : i32, i32, i32
  }
  func.func @transform_4(%arg0: i32, %arg1: i32) -> (i32, i32, i32) {
    %c0_i32 = arith.constant 0 : i32
    %c0_i32_0 = arith.constant 0 : i32
    %c0_i32_1 = arith.constant 0 : i32
    return %arg1, %c0_i32, %c0_i32_0 : i32, i32, i32
  }
  func.func @transform_5(%arg0: i32, %arg1: i32) -> (i32, i32, i32) {
    %c0_i32 = arith.constant 0 : i32
    %c0_i32_0 = arith.constant 0 : i32
    %c0_i32_1 = arith.constant 0 : i32
    return %arg1, %c0_i32, %c0_i32_0 : i32, i32, i32
  }
  func.func @transform_6(%arg0: i32, %arg1: i32) -> (i32, i32, i32) {
    %c0_i32 = arith.constant 0 : i32
    %c0_i32_0 = arith.constant 0 : i32
    %c0_i32_1 = arith.constant 0 : i32
    return %arg1, %c0_i32, %c0_i32_0 : i32, i32, i32
  }
  func.func @transform_7(%arg0: i32, %arg1: i32) -> (i32, i32, i32) {
    %c0_i32 = arith.constant 0 : i32
    %c0_i32_0 = arith.constant 0 : i32
    %c0_i32_1 = arith.constant 0 : i32
    return %arg1, %c0_i32, %c0_i32_0 : i32, i32, i32
  }
  func.func @transform_8(%arg0: i32, %arg1: i32) -> (i32, i32, i32) {
    %c0_i32 = arith.constant 0 : i32
    %c0_i32_0 = arith.constant 0 : i32
    %c0_i32_1 = arith.constant 0 : i32
    return %arg1, %c0_i32, %c0_i32_0 : i32, i32, i32
  }
  func.func @transform_9(%arg0: i32, %arg1: i32) -> (i32, i32, i32) {
    %c0_i32 = arith.constant 0 : i32
    %c0_i32_0 = arith.constant 0 : i32
    %c0_i32_1 = arith.constant 0 : i32
    return %arg1, %c0_i32, %c0_i32_0 : i32, i32, i32
  }
  func.func @transform_10(%arg0: i32, %arg1: i32) -> (i32, i32, i32) {
    %c0_i32 = arith.constant 0 : i32
    %c0_i32_0 = arith.constant 0 : i32
    %c0_i32_1 = arith.constant 0 : i32
    return %arg1, %c0_i32, %c0_i32_0 : i32, i32, i32
  }
  func.func @transform_11(%arg0: i32, %arg1: i32) -> (i32, i32, i32) {
    %c0_i32 = arith.constant 0 : i32
    %c0_i32_0 = arith.constant 0 : i32
    %c0_i32_1 = arith.constant 0 : i32
    return %arg1, %c0_i32, %c0_i32_0 : i32, i32, i32
  }
  func.func @transform_12(%arg0: i32, %arg1: i32) -> (i32, i32, i32) {
    %c0_i32 = arith.constant 0 : i32
    %c0_i32_0 = arith.constant 0 : i32
    %c0_i32_1 = arith.constant 0 : i32
    return %arg1, %c0_i32, %c0_i32_0 : i32, i32, i32
  }
  func.func @transform_13(%arg0: i32, %arg1: i32) -> (i32, i32, i32) {
    %c0_i32 = arith.constant 0 : i32
    %c0_i32_0 = arith.constant 0 : i32
    %c0_i32_1 = arith.constant 0 : i32
    return %arg1, %c0_i32, %c0_i32_0 : i32, i32, i32
  }
  func.func @transform_14(%arg0: i32, %arg1: i32) -> (i32, i32, i32) {
    %c0_i32 = arith.constant 0 : i32
    %c0_i32_0 = arith.constant 0 : i32
    %c0_i32_1 = arith.constant 0 : i32
    return %arg0, %c0_i32, %c0_i32_0 : i32, i32, i32
  }
}

module attributes {stable_mosaic.version = 11 : i64} {
  func.func @_decoder_logits_kernel(%arg0: i32, %arg1: i32, %arg2: memref<2x8x32xf32, #tpu.memory_space<vmem>>, %arg3: memref<32x32xbf16, #tpu.memory_space<vmem>>, %arg4: memref<1x32xf32, #tpu.memory_space<vmem>>, %arg5: memref<8x2x32xf32, #tpu.memory_space<vmem>>, %arg6: memref<8x2x1xf32, #tpu.memory_space<vmem>>, %arg7: memref<16x1xf32, #tpu.memory_space<vmem>>, %arg8: memref<16x1xf32, #tpu.memory_space<vmem>>) attributes {dimension_semantics = [#tpu.dimension_semantics<parallel>, #tpu.dimension_semantics<arbitrary>], iteration_bounds = array<i64: 1, 1>, scalar_prefetch = 0 : i64, scratch_operands = 2 : i64, tpu.core_type = #tpu.core_type<tc>, window_params = [{transform_indices = @transform_0, window_bounds = array<i64: 2, 8, 32>}, {transform_indices = @transform_1, window_bounds = array<i64: 32, 32>}, {transform_indices = @transform_2, window_bounds = array<i64: 1, 32>}, {transform_indices = @transform_3, window_bounds = array<i64: 8, 2, 32>}, {transform_indices = @transform_4, window_bounds = array<i64: 8, 2, 1>}]} {
    %c0_i32 = arith.constant 0 : i32
    %0 = arith.cmpi eq, %arg1, %c0_i32 : i32
    %1 = arith.extui %0 : i1 to i32
    %c0_i32_0 = arith.constant 0 : i32
    %2 = arith.cmpi ne, %1, %c0_i32_0 : i32
    scf.if %2 {
      %cst_26 = arith.constant 0xFF800000 : f32
      %42 = vector.broadcast %cst_26 : f32 to vector<16x1xf32>
      %c0_27 = arith.constant 0 : index
      %c0_28 = arith.constant 0 : index
      %43 = vector.load %arg7[%c0_27, %c0_28] : memref<16x1xf32, #tpu.memory_space<vmem>>, vector<16x1xf32>
      tpu.vector_store %arg7[%c0_27, %c0_28], %42 {strides = array<i32>} : memref<16x1xf32, #tpu.memory_space<vmem>>, vector<16x1xf32>,
      %cst_29 = arith.constant 0.000000e+00 : f32
      %44 = vector.broadcast %cst_29 : f32 to vector<16x1xf32>
      %c0_30 = arith.constant 0 : index
      %c0_31 = arith.constant 0 : index
      %45 = vector.load %arg8[%c0_30, %c0_31] : memref<16x1xf32, #tpu.memory_space<vmem>>, vector<16x1xf32>
      tpu.vector_store %arg8[%c0_30, %c0_31], %44 {strides = array<i32>} : memref<16x1xf32, #tpu.memory_space<vmem>>, vector<16x1xf32>,
    } else {
    }
    %c0 = arith.constant 0 : index
    %c0_1 = arith.constant 0 : index
    %c0_2 = arith.constant 0 : index
    %3 = vector.load %arg2[%c0, %c0_1, %c0_2] : memref<2x8x32xf32, #tpu.memory_space<vmem>>, vector<2x8x32xf32>
    %4 = vector.shape_cast %3 : vector<2x8x32xf32> to vector<16x32xf32>
    %c0_3 = arith.constant 0 : index
    %c0_4 = arith.constant 0 : index
    %5 = vector.load %arg3[%c0_3, %c0_4] : memref<32x32xbf16, #tpu.memory_space<vmem>>, vector<32x32xbf16>
    %6 = arith.truncf %4 : vector<16x32xf32> to vector<16x32xbf16>
    %cst = arith.constant dense<0.000000e+00> : vector<16x32xf32>
    %7 = tpu.matmul %6, %5, %cst {dimension_numbers = #tpu.dot_dimension_numbers<[1], [0], [0], [1], [0, 0, 1, 1], [], []>} : vector<16x32xbf16>, vector<32x32xbf16>, vector<16x32xf32> -> vector<16x32xf32>
    %c0_5 = arith.constant 0 : index
    %c0_6 = arith.constant 0 : index
    %8 = vector.load %arg4[%c0_5, %c0_6] : memref<1x32xf32, #tpu.memory_space<vmem>>, vector<1x32xf32>
    %9 = vector.broadcast %8 : vector<1x32xf32> to vector<16x32xf32>
    %10 = arith.addf %7, %9 : vector<16x32xf32>
    %c0_7 = arith.constant 0 : index
    %c0_8 = arith.constant 0 : index
    %11 = vector.load %arg7[%c0_7, %c0_8] : memref<16x1xf32, #tpu.memory_space<vmem>>, vector<16x1xf32>
    %cst_9 = arith.constant dense<0xFF800000> : vector<16xf32>
    %12 = vector.multi_reduction <maximumf>, %10, %cst_9 [1] : vector<16x32xf32> to vector<16xf32>
    %13 = vector.shape_cast %12 : vector<16xf32> to vector<16x1xf32>
    %14 = arith.maximumf %11, %13 : vector<16x1xf32>
    %c0_10 = arith.constant 0 : index
    %c0_11 = arith.constant 0 : index
    %15 = vector.load %arg8[%c0_10, %c0_11] : memref<16x1xf32, #tpu.memory_space<vmem>>, vector<16x1xf32>
    %c0_12 = arith.constant 0 : index
    %c0_13 = arith.constant 0 : index
    %16 = vector.load %arg7[%c0_12, %c0_13] : memref<16x1xf32, #tpu.memory_space<vmem>>, vector<16x1xf32>
    %17 = arith.subf %16, %14 : vector<16x1xf32>
    %18 = math.exp %17 : vector<16x1xf32>
    %19 = arith.mulf %15, %18 : vector<16x1xf32>
    %20 = vector.broadcast %14 : vector<16x1xf32> to vector<16x32xf32>
    %21 = arith.subf %10, %20 : vector<16x32xf32>
    %22 = math.exp %21 : vector<16x32xf32>
    %cst_14 = arith.constant dense<0.000000e+00> : vector<16xf32>
    %23 = vector.multi_reduction <add>, %22, %cst_14 [1] : vector<16x32xf32> to vector<16xf32>
    %24 = vector.shape_cast %23 : vector<16xf32> to vector<16x1xf32>
    %25 = arith.addf %19, %24 : vector<16x1xf32>
    %c0_15 = arith.constant 0 : index
    %c0_16 = arith.constant 0 : index
    %26 = vector.load %arg8[%c0_15, %c0_16] : memref<16x1xf32, #tpu.memory_space<vmem>>, vector<16x1xf32>
    tpu.vector_store %arg8[%c0_15, %c0_16], %25 {strides = array<i32>} : memref<16x1xf32, #tpu.memory_space<vmem>>, vector<16x1xf32>,
    %c0_17 = arith.constant 0 : index
    %c0_18 = arith.constant 0 : index
    %27 = vector.load %arg7[%c0_17, %c0_18] : memref<16x1xf32, #tpu.memory_space<vmem>>, vector<16x1xf32>
    tpu.vector_store %arg7[%c0_17, %c0_18], %14 {strides = array<i32>} : memref<16x1xf32, #tpu.memory_space<vmem>>, vector<16x1xf32>,
    %28 = vector.shape_cast %10 : vector<16x32xf32> to vector<2x8x32xf32>
    %29 = vector.extract_strided_slice %28 {offsets = [0, 0, 0], sizes = [1, 8, 32], strides = [1, 1, 1]} : vector<2x8x32xf32> to vector<1x8x32xf32>
    %30 = vector.shape_cast %29 : vector<1x8x32xf32> to vector<8x32xf32>
    %c0_19 = arith.constant 0 : index
    %c0_20 = arith.constant 0 : index
    %c0_21 = arith.constant 0 : index
    %31 = vector.load %arg5[%c0_19, %c0_20, %c0_21] : memref<8x2x32xf32, #tpu.memory_space<vmem>>, vector<8x1x32xf32>
    %32 = vector.shape_cast %31 : vector<8x1x32xf32> to vector<8x32xf32>
    %33 = vector.shape_cast %30 : vector<8x32xf32> to vector<8x1x32xf32>
    tpu.vector_store %arg5[%c0_19, %c0_20, %c0_21], %33 {strides = array<i32>} : memref<8x2x32xf32, #tpu.memory_space<vmem>>, vector<8x1x32xf32>,
    %34 = vector.extract_strided_slice %28 {offsets = [1, 0, 0], sizes = [1, 8, 32], strides = [1, 1, 1]} : vector<2x8x32xf32> to vector<1x8x32xf32>
    %35 = vector.shape_cast %34 : vector<1x8x32xf32> to vector<8x32xf32>
    %c0_22 = arith.constant 0 : index
    %c1 = arith.constant 1 : index
    %c0_23 = arith.constant 0 : index
    %36 = vector.load %arg5[%c0_22, %c1, %c0_23] : memref<8x2x32xf32, #tpu.memory_space<vmem>>, vector<8x1x32xf32>
    %37 = vector.shape_cast %36 : vector<8x1x32xf32> to vector<8x32xf32>
    %38 = vector.shape_cast %35 : vector<8x32xf32> to vector<8x1x32xf32>
    tpu.vector_store %arg5[%c0_22, %c1, %c0_23], %38 {strides = array<i32>} : memref<8x2x32xf32, #tpu.memory_space<vmem>>, vector<8x1x32xf32>,
    %c0_i32_24 = arith.constant 0 : i32
    %39 = arith.cmpi eq, %arg1, %c0_i32_24 : i32
    %40 = arith.extui %39 : i1 to i32
    %c0_i32_25 = arith.constant 0 : i32
    %41 = arith.cmpi ne, %40, %c0_i32_25 : i32
    scf.if %41 {
      %c0_26 = arith.constant 0 : index
      %c0_27 = arith.constant 0 : index
      %42 = vector.load %arg7[%c0_26, %c0_27] : memref<16x1xf32, #tpu.memory_space<vmem>>, vector<16x1xf32>
      %c0_28 = arith.constant 0 : index
      %c0_29 = arith.constant 0 : index
      %43 = vector.load %arg8[%c0_28, %c0_29] : memref<16x1xf32, #tpu.memory_space<vmem>>, vector<16x1xf32>
      %44 = math.log %43 : vector<16x1xf32>
      %45 = arith.addf %42, %44 : vector<16x1xf32>
      %46 = vector.shape_cast %45 : vector<16x1xf32> to vector<2x8x1xf32>
      %47 = vector.extract_strided_slice %46 {offsets = [0, 0, 0], sizes = [1, 8, 1], strides = [1, 1, 1]} : vector<2x8x1xf32> to vector<1x8x1xf32>
      %48 = vector.shape_cast %47 : vector<1x8x1xf32> to vector<8x1xf32>
      %c0_30 = arith.constant 0 : index
      %c0_31 = arith.constant 0 : index
      %c0_32 = arith.constant 0 : index
      %49 = vector.load %arg6[%c0_30, %c0_31, %c0_32] : memref<8x2x1xf32, #tpu.memory_space<vmem>>, vector<8x1x1xf32>
      %50 = vector.shape_cast %49 : vector<8x1x1xf32> to vector<8x1xf32>
      %51 = vector.shape_cast %48 : vector<8x1xf32> to vector<8x1x1xf32>
      tpu.vector_store %arg6[%c0_30, %c0_31, %c0_32], %51 {strides = array<i32>} : memref<8x2x1xf32, #tpu.memory_space<vmem>>, vector<8x1x1xf32>,
      %52 = vector.extract_strided_slice %46 {offsets = [1, 0, 0], sizes = [1, 8, 1], strides = [1, 1, 1]} : vector<2x8x1xf32> to vector<1x8x1xf32>
      %53 = vector.shape_cast %52 : vector<1x8x1xf32> to vector<8x1xf32>
      %c0_33 = arith.constant 0 : index
      %c1_34 = arith.constant 1 : index
      %c0_35 = arith.constant 0 : index
      %54 = vector.load %arg6[%c0_33, %c1_34, %c0_35] : memref<8x2x1xf32, #tpu.memory_space<vmem>>, vector<8x1x1xf32>
      %55 = vector.shape_cast %54 : vector<8x1x1xf32> to vector<8x1xf32>
      %56 = vector.shape_cast %53 : vector<8x1xf32> to vector<8x1x1xf32>
      tpu.vector_store %arg6[%c0_33, %c1_34, %c0_35], %56 {strides = array<i32>} : memref<8x2x1xf32, #tpu.memory_space<vmem>>, vector<8x1x1xf32>,
    } else {
    }
    return
  }
  func.func @transform_0(%arg0: i32, %arg1: i32) -> (i32, i32, i32) {
    %c0_i32 = arith.constant 0 : i32
    %c0_i32_0 = arith.constant 0 : i32
    %c0_i32_1 = arith.constant 0 : i32
    return %c0_i32, %arg0, %c0_i32_0 : i32, i32, i32
  }
  func.func @transform_1(%arg0: i32, %arg1: i32) -> (i32, i32) {
    %c0_i32 = arith.constant 0 : i32
    %c0_i32_0 = arith.constant 0 : i32
    return %c0_i32, %arg1 : i32, i32
  }
  func.func @transform_2(%arg0: i32, %arg1: i32) -> (i32, i32) {
    %c0_i32 = arith.constant 0 : i32
    %c0_i32_0 = arith.constant 0 : i32
    return %c0_i32, %arg1 : i32, i32
  }
  func.func @transform_3(%arg0: i32, %arg1: i32) -> (i32, i32, i32) {
    %c0_i32 = arith.constant 0 : i32
    %c0_i32_0 = arith.constant 0 : i32
    return %arg0, %c0_i32, %arg1 : i32, i32, i32
  }
  func.func @transform_4(%arg0: i32, %arg1: i32) -> (i32, i32, i32) {
    %c0_i32 = arith.constant 0 : i32
    %c0_i32_0 = arith.constant 0 : i32
    %c0_i32_1 = arith.constant 0 : i32
    return %arg0, %c0_i32, %c0_i32_0 : i32, i32, i32
  }
}

module attributes {stable_mosaic.version = 11 : i64} {
  func.func @_decoder_norm_kernel(%arg0: i32, %arg1: i32, %arg2: memref<8x2x32xf32, #tpu.memory_space<vmem>>, %arg3: memref<8x2x1xf32, #tpu.memory_space<vmem>>, %arg4: memref<8x2x32xf32, #tpu.memory_space<vmem>>) attributes {dimension_semantics = [#tpu.dimension_semantics<parallel>, #tpu.dimension_semantics<parallel>], iteration_bounds = array<i64: 1, 1>, scalar_prefetch = 0 : i64, scratch_operands = 0 : i64, tpu.core_type = #tpu.core_type<tc>, window_params = [{transform_indices = @transform_0, window_bounds = array<i64: 8, 2, 32>}, {transform_indices = @transform_1, window_bounds = array<i64: 8, 2, 1>}, {transform_indices = @transform_2, window_bounds = array<i64: 8, 2, 32>}]} {
    %c0 = arith.constant 0 : index
    %c0_0 = arith.constant 0 : index
    %c0_1 = arith.constant 0 : index
    %0 = vector.load %arg2[%c0, %c0_0, %c0_1] : memref<8x2x32xf32, #tpu.memory_space<vmem>>, vector<8x2x32xf32>
    %c0_2 = arith.constant 0 : index
    %c0_3 = arith.constant 0 : index
    %c0_4 = arith.constant 0 : index
    %1 = vector.load %arg3[%c0_2, %c0_3, %c0_4] : memref<8x2x1xf32, #tpu.memory_space<vmem>>, vector<8x2x1xf32>
    %2 = vector.broadcast %1 : vector<8x2x1xf32> to vector<8x2x32xf32>
    %3 = arith.subf %0, %2 : vector<8x2x32xf32>
    %c0_5 = arith.constant 0 : index
    %c0_6 = arith.constant 0 : index
    %c0_7 = arith.constant 0 : index
    %4 = vector.load %arg4[%c0_5, %c0_6, %c0_7] : memref<8x2x32xf32, #tpu.memory_space<vmem>>, vector<8x2x32xf32>
    tpu.vector_store %arg4[%c0_5, %c0_6, %c0_7], %3 {strides = array<i32>} : memref<8x2x32xf32, #tpu.memory_space<vmem>>, vector<8x2x32xf32>,
    return
  }
  func.func @transform_0(%arg0: i32, %arg1: i32) -> (i32, i32, i32) {
    %c0_i32 = arith.constant 0 : i32
    %c0_i32_0 = arith.constant 0 : i32
    return %arg0, %c0_i32, %arg1 : i32, i32, i32
  }
  func.func @transform_1(%arg0: i32, %arg1: i32) -> (i32, i32, i32) {
    %c0_i32 = arith.constant 0 : i32
    %c0_i32_0 = arith.constant 0 : i32
    %c0_i32_1 = arith.constant 0 : i32
    return %arg0, %c0_i32, %c0_i32_0 : i32, i32, i32
  }
  func.func @transform_2(%arg0: i32, %arg1: i32) -> (i32, i32, i32) {
    %c0_i32 = arith.constant 0 : i32
    %c0_i32_0 = arith.constant 0 : i32
    return %arg0, %c0_i32, %arg1 : i32, i32, i32
  }
}

</mosaic_0001>

<bundles_post_ra>
// kernel: transformer_forward.5
= control target key start
LH: loop header
LB: loop body
LE: loop exit
PB: predicated region body
PF: predicated region fallthrough
CT: control target
= control target key end

     0   :  { %7 = vsyncpa [#allocation3], 0  ;;  %s285_s0 = inlined_call_operand.hbm [shape: f32[8,2,32], index: 0, kind: input, shape index: {}]   ;;  %s286_s1 = inlined_call_operand.hbm [shape: f32[8,2,1], index: 1, kind: input, shape index: {}]   ;;  %s287_s2 = inlined_call_operand.hbm [shape: f32[8,2,32], index: 2, kind: output, shape index: {}]  }
   0x1   :  { %8 = vsyncpa [#allocation6], 0 }
   0x2   :  { %9 = vsyncpa [#allocation4], 0  ;;  %s211_s9 = smov [#allocation2]   ;;  %s139_s13 = scalar_lea.hbm %s285_s0, 256 }
   0x3   :  { %s15_s10 = sshll.u32 %s211_s9, 4  ;;  %p140_p0 = scmp.ne.s32.totalorder %s285_s0, %s139_s13  ;;  %s16_s10 = int_to_ptr.vmem [resolvable:$true] %s15_s10 }
   0x4   :  { %p143_p1 = scmp.lt.u32.totalorder %s139_s13, %s285_s0 }
   0x6   :  { %p145_p2 = pnand %p143_p1, %p140_p0 }
   0x8   :  { %148 = shalt.err (!%p145_p2)
}
   0x9   :  { %s149_s18 = scalar_lea.vmem %s16_s10, 256  ;;  %p154_p4 = scmp.lt.s32.totalorder %s16_s10, %s16_s10 }
   0xa   :  { %p150_p3 = scmp.ne.s32.totalorder %s16_s10, %s149_s18  ;;  %p155_p5 = scmp.lt.s32.totalorder %s149_s18, %s149_s18 }
   0xc   :  { %p156_p6 = por %p155_p5, %p154_p4 }
   0xe   :  { %p157_p7 = pnand %p156_p6, %p150_p3 }
  0x10   :  { %160 = shalt.err (!%p157_p7)
}
  0x11   :  { %s212_s19 = smov 32   ;;  %s213_s20 = smov 2  }
  0x12   :  { %21 = dma.hbm_to_vmem [thread:$0]  %s285_s0, 256, %s16_s10, [#allocation3], %s212_s19, %s212_s19, %s213_s20  }
  0x13   :  { %s214_s23 = smov [#allocation5]   ;;  %s161_s27 = scalar_lea.hbm %s286_s1, 256 }
  0x14   :  { %s27_s24 = sshll.u32 %s214_s23, 4  ;;  %p162_p8 = scmp.ne.s32.totalorder %s286_s1, %s161_s27  ;;  %s28_s24 = int_to_ptr.vmem [resolvable:$true] %s27_s24 }
  0x15   :  { %p165_p9 = scmp.lt.u32.totalorder %s161_s27, %s286_s1 }
  0x17   :  { %p167_p10 = pnand %p165_p9, %p162_p8 }
  0x19   :  { %170 = shalt.err (!%p167_p10)
}
  0x1a   :  { %s171_s4 = scalar_lea.vmem %s28_s24, 256  ;;  %p176_p12 = scmp.lt.s32.totalorder %s28_s24, %s28_s24 }
  0x1b   :  { %p172_p11 = scmp.ne.s32.totalorder %s28_s24, %s171_s4  ;;  %p177_p13 = scmp.lt.s32.totalorder %s171_s4, %s171_s4 }
  0x1d   :  { %p178_p0 = por %p177_p13, %p176_p12 }
  0x1f   :  { %p179_p1 = pnand %p178_p0, %p172_p11 }
  0x21   :  { %182 = shalt.err (!%p179_p1)
}
  0x22   :  { %33 = dma.hbm_to_vmem [thread:$0]  %s286_s1, 256, %s28_s24, [#allocation6], %s212_s19, %s212_s19, %s213_s20  }
  0x23   :  { %205 = dma.done.wait [#allocation3], 256  }
  0x24   :  { %206 = vsyncadd [#allocation3], 4294967040 }
  0x25   :  { %207 = dma.done.wait [#allocation6], 256  }
  0x26   :  { %208 = vsyncadd [#allocation6], 4294967040  ;;  %v215_v0 = vmov 0   ;;  %v50_v1 = vld [vmem:[#allocation5 + $0x4] sm:$0x3]  ;;  %vm104_vm0 = vcmask 254976  }
  0x27   :  { %138 = vset.pattern.permute.xlu1 %v215_v0  ;;  %137 = vset.pattern.permute.xlu0 %v215_v0  ;;  %v48_v2 = vld [vmem:[#allocation5] sm:$0x3]  ;;  %v51_v3 = vld [vmem:[#allocation5 + $0x6] sm:$0x3]  ;;  %v49_v4 = vld [vmem:[#allocation5 + $0x2] sm:$0x3] }
  0x28   :  { %68 = vperm.xlu1 %138, %v50_v1   ;;  %58 = vperm.xlu0 %137, %v48_v2   ;;  %v53_v5 = vld [vmem:[#allocation5 + $0xa] sm:$0x3]  ;;  %v52_v6 = vld [vmem:[#allocation5 + $0x8] sm:$0x3]  ;;  %v55_v7 = vld [vmem:[#allocation5 + $0xe] sm:$0x3] }
  0x29   :  { %v54_v8 = vld [vmem:[#allocation5 + $0xc] sm:$0x3]  ;;  %v42_v9 = vld [vmem:[#allocation2 + $0x4] sm:$0x3]  ;;  %v40_v10 = vld [vmem:[#allocation2] sm:$0x3] }
  0x2a   :  { %v43_v15 = vld [vmem:[#allocation2 + $0x6] sm:$0x3]  ;;  %v41_v16 = vld [vmem:[#allocation2 + $0x2] sm:$0x3]  ;;  %v45_v21 = vld [vmem:[#allocation2 + $0xa] sm:$0x3] }
  0x2b   :  { %v44_v22 = vld [vmem:[#allocation2 + $0x8] sm:$0x3]  ;;  %v47_v27 = vld [vmem:[#allocation2 + $0xe] sm:$0x3]  ;;  %v46_v28 = vld [vmem:[#allocation2 + $0xc] sm:$0x3] }
  0x2c   :  { %73 = vperm.xlu1 %138, %v51_v3   ;;  %63 = vperm.xlu0 %137, %v49_v4   ;;  %s216_s1 = smov [#allocation7]  }
  0x2d   :  { %s118_s6 = sshll.u32 %s216_s1, 4  ;;  %s119_s6 = int_to_ptr.vmem [resolvable:$true] %s118_s6 }
  0x2e   :  { %s183_s7 = scalar_lea.vmem %s119_s6, 256  ;;  %p188_p3 = scmp.lt.s32.totalorder %s119_s6, %s119_s6 }
  0x2f   :  { %p184_p2 = scmp.ne.s32.totalorder %s119_s6, %s183_s7  ;;  %p189_p4 = scmp.lt.s32.totalorder %s183_s7, %s183_s7 }
  0x30   :  { %83 = vperm.xlu1 %138, %v53_v5   ;;  %78 = vperm.xlu0 %137, %v52_v6  }
  0x31   :  { %p190_p5 = por %p189_p4, %p188_p3 }
  0x33   :  { %p191_p6 = pnand %p190_p5, %p184_p2 }
  0x34   :  { %93 = vperm.xlu1 %138, %v55_v7   ;;  %88 = vperm.xlu0 %137, %v54_v8  }
  0xa7   :  { %v69_v11 = vpop.permute.xlu1 %68  ;;  %v59_v12 = vpop.permute.xlu0 %58 }
  0xa8   :  { %v98_v13 = vsub.f32 %v42_v9, %v69_v11  ;;  %v96_v14 = vsub.f32 %v40_v10, %v59_v12 }
  0xaa   :  { %107 = vst.msk [vmem:[#allocation7 + $0x4] sm:$0x3] %vm104_vm0, %v98_v13  ;;  %105 = vst.msk [vmem:[#allocation7] sm:$0x3] %vm104_vm0, %v96_v14 }
  0xab   :  { %v74_v17 = vpop.permute.xlu1 %73  ;;  %v64_v18 = vpop.permute.xlu0 %63 }
  0xac   :  { %v99_v19 = vsub.f32 %v43_v15, %v74_v17  ;;  %v97_v20 = vsub.f32 %v41_v16, %v64_v18 }
  0xae   :  { %108 = vst.msk [vmem:[#allocation7 + $0x6] sm:$0x3] %vm104_vm0, %v99_v19  ;;  %106 = vst.msk [vmem:[#allocation7 + $0x2] sm:$0x3] %vm104_vm0, %v97_v20 }
  0xaf   :  { %v84_v23 = vpop.permute.xlu1 %83  ;;  %v79_v24 = vpop.permute.xlu0 %78 }
  0xb0   :  { %v101_v25 = vsub.f32 %v45_v21, %v84_v23  ;;  %v100_v26 = vsub.f32 %v44_v22, %v79_v24 }
  0xb2   :  { %110 = vst.msk [vmem:[#allocation7 + $0xa] sm:$0x3] %vm104_vm0, %v101_v25  ;;  %109 = vst.msk [vmem:[#allocation7 + $0x8] sm:$0x3] %vm104_vm0, %v100_v26 }
  0xb3   :  { %v94_v29 = vpop.permute.xlu1 %93  ;;  %v89_v30 = vpop.permute.xlu0 %88 }
  0xb4   :  { %v103_v31 = vsub.f32 %v47_v27, %v94_v29  ;;  %v102_v32 = vsub.f32 %v46_v28, %v89_v30 }
  0xb6   :  { %112 = vst.msk [vmem:[#allocation7 + $0xe] sm:$0x3] %vm104_vm0, %v103_v31  ;;  %111 = vst.msk [vmem:[#allocation7 + $0xc] sm:$0x3] %vm104_vm0, %v102_v32 }
  0xb7   :  { %194 = shalt.err (!%p191_p6)
}
  0xb8   :  { %s195_s10 = scalar_lea.hbm %s287_s2, 256 }
  0xb9   :  { %p196_p7 = scmp.ne.s32.totalorder %s287_s2, %s195_s10  ;;  %p199_p8 = scmp.lt.u32.totalorder %s195_s10, %s287_s2 }
  0xbb   :  { %p201_p9 = pnand %p199_p8, %p196_p7 }
  0xbd   :  { %204 = shalt.err (!%p201_p9)
}
  0xbe   :  { %124 = dma.vmem_to_hbm [thread:$0]  %s119_s6, 256, %s287_s2, [#allocation4], %s212_s19, %s212_s19, %s213_s20  }
  0xbf   :  { %209 = dma.done.wait [#allocation4], 256  }
  0xc0   :  { %210 = vsyncadd [#allocation4], 4294967040 }
  0xc1   :  { %128 = vsyncpa [#allocation3], 1 }
  0xc2   :  { %129 = vsyncpa [#allocation6], 1 }
  0xc3   :  { %130 = vsyncpa [#allocation4], 1 }

// kernel: transformer_forward.4
= control target key start
LH: loop header
LB: loop body
LE: loop exit
PB: predicated region body
PF: predicated region fallthrough
CT: control target
= control target key end

     0   :  { %10 = vsyncpa [#allocation5], 0  ;;  %s857_s0 = inlined_call_operand.hbm [shape: f32[2,8,32], index: 0, kind: input, shape index: {}]   ;;  %s858_s1 = inlined_call_operand.hbm [shape: bf16[32,32], index: 1, kind: input, shape index: {}]   ;;  %s859_s2 = inlined_call_operand.hbm [shape: f32[1,32], index: 2, kind: input, shape index: {}]   ;;  %s860_s3 = inlined_call_operand.hbm [shape: f32[8,2,32], index: 3, kind: output, shape index: {0}]   ;;  %s861_s4 = inlined_call_operand.hbm [shape: f32[8,2,1], index: 4, kind: output, shape index: {1}]  }
   0x1   :  { %11 = vsyncpa [#allocation8], 0 }
   0x2   :  { %12 = vsyncpa [#allocation6], 0 }
   0x3   :  { %13 = vsyncpa [#allocation12], 0  ;;  %s665_s15 = smov [#allocation7]   ;;  %s547_s19 = scalar_lea.hbm %s858_s1, 256 }
   0x4   :  { %s31_s16 = sshll.u32 %s665_s15, 4  ;;  %p548_p0 = scmp.ne.s32.totalorder %s858_s1, %s547_s19  ;;  %s32_s16 = int_to_ptr.vmem [resolvable:$true] %s31_s16 }
   0x5   :  { %p551_p1 = scmp.lt.u32.totalorder %s547_s19, %s858_s1 }
   0x7   :  { %p553_p2 = pnand %p551_p1, %p548_p0 }
   0x9   :  { %556 = shalt.err (!%p553_p2)
}
   0xa   :  { %s557_s24 = scalar_lea.vmem %s32_s16, 256  ;;  %p562_p4 = scmp.lt.s32.totalorder %s32_s16, %s32_s16 }
   0xb   :  { %p558_p3 = scmp.ne.s32.totalorder %s32_s16, %s557_s24  ;;  %p563_p5 = scmp.lt.s32.totalorder %s557_s24, %s557_s24 }
   0xd   :  { %p564_p6 = por %p563_p5, %p562_p4 }
   0xf   :  { %p565_p7 = pnand %p564_p6, %p558_p3 }
  0x11   :  { %568 = shalt.err (!%p565_p7)
}
  0x12   :  { %s666_s25 = smov 64   ;;  %s667_s26 = smov 4  }
  0x13   :  { %37 = dma.hbm_to_vmem [thread:$0]  %s858_s1, 256, %s32_s16, [#allocation8], %s666_s25, %s666_s25, %s667_s26  }
  0x14   :  { %s668_s29 = smov [#allocation4]   ;;  %s569_s7 = scalar_lea.hbm %s857_s0, 256 }
  0x15   :  { %s19_s30 = sshll.u32 %s668_s29, 4  ;;  %p570_p8 = scmp.ne.s32.totalorder %s857_s0, %s569_s7  ;;  %s20_s30 = int_to_ptr.vmem [resolvable:$true] %s19_s30 }
  0x16   :  { %p573_p9 = scmp.lt.u32.totalorder %s569_s7, %s857_s0 }
  0x18   :  { %p575_p10 = pnand %p573_p9, %p570_p8 }
  0x1a   :  { %578 = shalt.err (!%p575_p10)
}
  0x1b   :  { %s579_s12 = scalar_lea.vmem %s20_s30, 256  ;;  %p584_p12 = scmp.lt.s32.totalorder %s20_s30, %s20_s30 }
  0x1c   :  { %p580_p11 = scmp.ne.s32.totalorder %s20_s30, %s579_s12  ;;  %p585_p13 = scmp.lt.s32.totalorder %s579_s12, %s579_s12 }
  0x1e   :  { %p586_p0 = por %p585_p13, %p584_p12 }
  0x20   :  { %p587_p1 = pnand %p586_p0, %p580_p11 }
  0x22   :  { %590 = shalt.err (!%p587_p1)
}
  0x23   :  { %s669_s1 = smov 128   ;;  %s670_s13 = smov 8  }
  0x24   :  { %25 = dma.hbm_to_vmem [thread:$0]  %s857_s0, 256, %s20_s30, [#allocation5], %s669_s1, %s669_s1, %s670_s13  }
  0x25   :  { %s671_s16 = smov [#allocation9]   ;;  %s591_s20 = scalar_lea.hbm %s859_s2, 16 }
  0x26   :  { %s44_s17 = sshll.u32 %s671_s16, 4  ;;  %p592_p2 = scmp.ne.s32.totalorder %s859_s2, %s591_s20  ;;  %s45_s17 = int_to_ptr.vmem [resolvable:$true] %s44_s17 }
  0x27   :  { %p595_p3 = scmp.lt.u32.totalorder %s591_s20, %s859_s2 }
  0x29   :  { %p597_p4 = pnand %p595_p3, %p592_p2 }
  0x2b   :  { %600 = shalt.err (!%p597_p4)
}
  0x2c   :  { %s601_s25 = scalar_lea.vmem %s45_s17, 16  ;;  %s605_s0 = scalar_lea.vmem %s45_s17, 32 }
  0x2d   :  { %p602_p5 = scmp.ne.s32.totalorder %s45_s17, %s601_s25  ;;  %p606_p6 = scmp.lt.s32.totalorder %s45_s17, %s45_s17 }
  0x2e   :  { %p607_p7 = scmp.lt.s32.totalorder %s605_s0, %s601_s25 }
  0x30   :  { %p608_p8 = por %p607_p7, %p606_p6 }
  0x32   :  { %p609_p9 = pnand %p608_p8, %p602_p5 }
  0x34   :  { %612 = shalt.err (!%p609_p9)
}
  0x35   :  { %47 = dma.hbm_to_vmem [thread:$0]  %s859_s2, 16, %s45_s17, [#allocation8]  }
  0x36   :  { %657 = dma.done.wait [#allocation5], 256  }
  0x37   :  { %658 = vsyncadd [#allocation5], 4294967040 }
  0x38   :  { %659 = dma.done.wait [#allocation8], 272  }
  0x39   :  { %660 = vsyncadd [#allocation8], 4294967024  ;;  %vm62_vm0 = vcmask 7168   ;;  %v672_v0 = vmov 0.0   ;;  %vm673_vm1 = vmmov 0   ;;  %v533_v1 = vld [vmem:[#allocation7] sm:$0xff]   ;;  %v192_v9 = vlaneseq }
  0x3a   :  { %65 = vst.msk [vmem:[#allocation3] sm:$0xff] %vm62_vm0, %v672_v0  ;;  %66 = vst.msk [vmem:[#allocation3 + $0x8] sm:$0xff] %vm62_vm0, %v672_v0  ;;  %507 = vmatprep.subr.bf16.mxu0 %v672_v0  ;;  %511 = vmatprep.mubr.msk.bf16.mxu0 %vm673_vm1, %v672_v0  ;;  %v534_v2 = vld [vmem:[#allocation7 + $0x8] sm:$0xff]   ;;  %v67_v3 = vld [vmem:[#allocation4] sm:$0xff]  ;;  %vm93_vm2 = vcmask 261120   ;;  %v674_v6 = vmov -inf  }
  0x3b   :  { %508 = vmatpush3.bf16.msra.mxu0 %v533_v1  ;;  %v68_v4 = vld [vmem:[#allocation4 + $0x8] sm:$0xff]  ;;  %63 = vst.msk [vmem:[#allocation2] sm:$0xff] %vm62_vm0, %v674_v6  ;;  %64 = vst.msk [vmem:[#allocation2 + $0x8] sm:$0xff] %vm62_vm0, %v674_v6  ;;  %v675_v7 = vmov 1966171168   ;;  %v193_v11 = vshrl.u32 %v192_v9, 7 }
  0x3c   :  { %509 = vmatprep.subr.bf16.mxu0 %v672_v0  ;;  %v73_v5 = vpack.c.bf16 %v68_v4, %v67_v3  ;;  %v190_v8 = vunpack.c.l.s4 %v675_v7  ;;  %v500_v12 = vld [vmem:[#allocation9] ss:$0 sm:$0xff]  ;;  %vm245_vm3 = vcmask 253952   ;;  %v676_v48 = vmov 0   ;;  %s677_s2 = smov [#allocation10]  }
  0x3d   :  { %531 = vset.pattern.permute.xlu1 %v676_v48  ;;  %532 = vset.pattern.permute.xlu0 %v676_v48  ;;  %s471_s28 = sshll.u32 %s677_s2, 4  ;;  %s472_s28 = int_to_ptr.vmem [resolvable:$true] %s471_s28 }
  0x3e   :  { %v191_v10 = vunpack.c.0.s8 %v190_v8  ;;  %s613_s29 = scalar_lea.vmem %s472_s28, 256  ;;  %p618_p11 = scmp.lt.s32.totalorder %s472_s28, %s472_s28 }
  0x3f   :  { %510 = vmatpush3.bf16.msra.mxu0 %v534_v2  ;;  %p614_p10 = scmp.ne.s32.totalorder %s472_s28, %s613_s29  ;;  %p619_p12 = scmp.lt.s32.totalorder %s613_s29, %s613_s29 }
  0x40   :  { %v747_v13 = vsub.s32 %v191_v10, %v193_v11 }
  0x41   :  { %p620_p13 = por %p619_p12, %p618_p11 }
  0x42   :  { %512 = vmatmul.mubr.msk.bf16.vlgmr.msra.gmra.mrb[0].mxu0 %vm93_vm2, %v73_v5  ;;  %v138_v49 = vld [vmem:[#allocation2] sm:$0xff]  ;;  %v139_v52 = vld [vmem:[#allocation2 + $0x8] sm:$0xff] }
  0x43   :  { %p621_p0 = pnand %p620_p13, %p614_p10 }
 0x115   :  { %v131_v14 = vpop.f32.mrb[0].mxu0 }
 0x116   :  { %v749_v15 = vadd.f32 %v500_v12, %v131_v14  ;;  %v513_v16 = vpop.f32.mrb[1].mxu0 }
 0x117   :  { %v134_v17 = vpop.f32.mrb[2].mxu0 }
 0x118   :  { %v188_v18 = vcombine.high %v749_v15, %v749_v15  ;;  %v195_v19 = vrot.slane %v749_v15, %v747_v13  ;;  %v755_v20 = vadd.f32 %v500_v12, %v134_v17  ;;  %v514_v21 = vpop.f32.mrb[3].mxu0  ;;  %v140_v22 = vsel %vm93_vm2, %v749_v15, -inf }
 0x119   :  { %141 = vmax.xlane.f32.xlu0 %v140_v22 }
 0x11a   :  { %v202_v23 = vrot.slane %v188_v18, %v747_v13  ;;  %v203_v24 = vcombine.high %v195_v19, %v195_v19  ;;  %v211_v25 = vrot.slane %v195_v19, %v747_v13  ;;  %v255_v26 = vcombine.high %v755_v20, %v755_v20 }
 0x11b   :  { %v262_v27 = vrot.slane %v755_v20, %v747_v13  ;;  %v143_v28 = vsel %vm93_vm2, %v755_v20, -inf }
 0x11c   :  { %v204_v29 = vcombine.high %v202_v23, %v202_v23  ;;  %v218_v30 = vrot.slane %v202_v23, %v747_v13  ;;  %v225_v31 = vrot.slane %v203_v24, %v747_v13  ;;  %v233_v32 = vcombine.high %v211_v25, %v211_v25  ;;  %246 = vst.msk [vmem:[#allocation10] sm:$0x1] %vm245_vm3, %v211_v25 }
 0x11d   :  { %v269_v33 = vrot.slane %v255_v26, %v747_v13  ;;  %v270_v34 = vcombine.high %v262_v27, %v262_v27  ;;  %v278_v35 = vrot.slane %v262_v27, %v747_v13  ;;  %144 = vmax.xlane.f32.xlu0 %v143_v28 }
 0x11e   :  { %v232_v36 = vrot.slane %v204_v29, %v747_v13  ;;  %v234_v37 = vcombine.high %v218_v30, %v218_v30  ;;  %v235_v38 = vcombine.high %v225_v31, %v225_v31  ;;  %247 = vst.msk [vmem:[#allocation10 + $0x2] sm:$0x1] %vm245_vm3, %v225_v31  ;;  %248 = vst.msk [vmem:[#allocation10 + $0x4] sm:$0x1] %vm245_vm3, %v233_v32 }
 0x11f   :  { %250 = vst.msk [vmem:[#allocation10 + $0x8] sm:$0x1] %vm245_vm3, %v218_v30  ;;  %v271_v39 = vcombine.high %v269_v33, %v269_v33  ;;  %v285_v40 = vrot.slane %v269_v33, %v747_v13  ;;  %v292_v41 = vrot.slane %v270_v34, %v747_v13  ;;  %v300_v42 = vcombine.high %v278_v35, %v278_v35 }
 0x120   :  { %312 = vst.msk [vmem:[#allocation10 + $0x1] sm:$0x1] %vm245_vm3, %v278_v35  ;;  %v236_v43 = vcombine.high %v232_v36, %v232_v36  ;;  %249 = vst.msk [vmem:[#allocation10 + $0x6] sm:$0x1] %vm245_vm3, %v235_v38 }
 0x121   :  { %251 = vst.msk [vmem:[#allocation10 + $0xa] sm:$0x1] %vm245_vm3, %v232_v36  ;;  %252 = vst.msk [vmem:[#allocation10 + $0xc] sm:$0x1] %vm245_vm3, %v234_v37  ;;  %v299_v44 = vrot.slane %v271_v39, %v747_v13  ;;  %v301_v45 = vcombine.high %v285_v40, %v285_v40  ;;  %v302_v46 = vcombine.high %v292_v41, %v292_v41 }
 0x122   :  { %313 = vst.msk [vmem:[#allocation10 + $0x3] sm:$0x1] %vm245_vm3, %v292_v41  ;;  %314 = vst.msk [vmem:[#allocation10 + $0x5] sm:$0x1] %vm245_vm3, %v300_v42 }
 0x123   :  { %316 = vst.msk [vmem:[#allocation10 + $0x9] sm:$0x1] %vm245_vm3, %v285_v40  ;;  %253 = vst.msk [vmem:[#allocation10 + $0xe] sm:$0x1] %vm245_vm3, %v236_v43  ;;  %v303_v47 = vcombine.high %v299_v44, %v299_v44 }
 0x124   :  { %315 = vst.msk [vmem:[#allocation10 + $0x7] sm:$0x1] %vm245_vm3, %v302_v46  ;;  %317 = vst.msk [vmem:[#allocation10 + $0xb] sm:$0x1] %vm245_vm3, %v299_v44 }
 0x125   :  { %318 = vst.msk [vmem:[#allocation10 + $0xd] sm:$0x1] %vm245_vm3, %v301_v45  ;;  %319 = vst.msk [vmem:[#allocation10 + $0xf] sm:$0x1] %vm245_vm3, %v303_v47 }
 0x1a6   :  { %v142_v50 = vpop.xlane.xlu0 %141 }
 0x1a7   :  { %v146_v51 = vmax.f32 %v138_v49, %v142_v50 }
 0x1a9   :  { %v150_v53 = vsub.f32 %v138_v49, %v146_v51  ;;  %185 = vst.msk [vmem:[#allocation2] sm:$0xff] %vm62_vm0, %v146_v51  ;;  %160 = vperm.xlu1 %531, %v146_v51  }
 0x1aa   :  { %v145_v54 = vpop.xlane.xlu0 %144 }
 0x1ab   :  { %v147_v55 = vmax.f32 %v139_v52, %v145_v54 }
 0x1ad   :  { %v151_v56 = vsub.f32 %v139_v52, %v147_v55  ;;  %186 = vst.msk [vmem:[#allocation2 + $0x8] sm:$0xff] %vm62_vm0, %v147_v55  ;;  %165 = vperm.xlu1 %531, %v147_v55  }
 0x228   :  { %v161_v57 = vpop.permute.xlu1 %160 }
 0x229   :  { %v168_v58 = vsub.f32 %v749_v15, %v161_v57 }
 0x22b   :  { %v170_v59 = vmul.f32 1.442695, %v168_v58 }
 0x22c   :  { %v166_v60 = vpop.permute.xlu1 %165 }
 0x22d   :  { %535 = vpow2.f32 %v170_v59  ;;  %v169_v61 = vsub.f32 %v755_v20, %v166_v60 }
 0x22f   :  { %v172_v62 = vmul.f32 1.442695, %v169_v61 }
 0x231   :  { %537 = vpow2.f32 %v172_v62 }
 0x237   :  { %v536_v63 = vpop.eup %535 }
 0x238   :  { %v174_v0 = vsel %vm93_vm2, %v536_v63, 0.0 }
 0x239   :  { %175 = vadd.xlane.f32.xlu0 %v174_v0 }
 0x23b   :  { %v538_v1 = vpop.eup %537 }
 0x23c   :  { %v177_v2 = vsel %vm93_vm2, %v538_v1, 0.0 }
 0x23d   :  { %178 = vadd.xlane.f32.xlu1 %v177_v2 }
 0x23e   :  { %624 = shalt.err (!%p621_p0)
}
 0x23f   :  { %s625_s6 = scalar_lea.hbm %s860_s3, 256 }
 0x240   :  { %p626_p1 = scmp.ne.s32.totalorder %s860_s3, %s625_s6  ;;  %p629_p2 = scmp.lt.u32.totalorder %s625_s6, %s860_s3 }
 0x242   :  { %p631_p3 = pnand %p629_p2, %p626_p1 }
 0x244   :  { %634 = shalt.err (!%p631_p3)
}
 0x245   :  { %s678_s11 = smov 32   ;;  %s679_s12 = smov 2   ;;  %v152_v3 = vmul.f32 1.442695, %v150_v53  ;;  %v154_v4 = vmul.f32 1.442695, %v151_v56 }
 0x246   :  { %477 = dma.vmem_to_hbm [thread:$0]  %s472_s28, 256, %s860_s3, [#allocation6], %s678_s11, %s678_s11, %s679_s12   ;;  %v148_v6 = vld [vmem:[#allocation3] sm:$0xff]  ;;  %v149_v10 = vld [vmem:[#allocation3 + $0x8] sm:$0xff]  ;;  %v323_v20 = vld [vmem:[#allocation2] sm:$0xff]  ;;  %vm391_vm4 = vcmask 0  }
 0x247   :  { %539 = vpow2.f32 %v152_v3  ;;  %v324_v26 = vld [vmem:[#allocation2 + $0x8] sm:$0xff]  ;;  %s680_s3 = smov [#allocation11]  }
 0x248   :  { %541 = vpow2.f32 %v154_v4  ;;  %s483_s14 = sshll.u32 %s680_s3, 4  ;;  %s484_s14 = int_to_ptr.vmem [resolvable:$true] %s483_s14 }
 0x249   :  { %s635_s15 = scalar_lea.vmem %s484_s14, 256  ;;  %p640_p5 = scmp.lt.s32.totalorder %s484_s14, %s484_s14 }
 0x24a   :  { %p636_p4 = scmp.ne.s32.totalorder %s484_s14, %s635_s15  ;;  %p641_p6 = scmp.lt.s32.totalorder %s635_s15, %s635_s15 }
 0x24c   :  { %p642_p7 = por %p641_p6, %p640_p5 }
 0x24e   :  { %p643_p8 = pnand %p642_p7, %p636_p4 }
 0x251   :  { %v540_v5 = vpop.eup %539 }
 0x252   :  { %v156_v7 = vmul.f32 %v540_v5, %v148_v6  ;;  %v542_v8 = vpop.eup %541 }
 0x253   :  { %v157_v12 = vmul.f32 %v542_v8, %v149_v10 }
 0x2c6   :  { %v176_v9 = vpop.xlane.xlu0 %175 }
 0x2c7   :  { %v180_v11 = vadd.f32 %v176_v9, %v156_v7 }
 0x2c9   :  { %183 = vst.msk [vmem:[#allocation3] sm:$0xff] %vm62_vm0, %v180_v11 }
 0x2ca   :  { %v179_v14 = vpop.xlane.xlu1 %178 }
 0x2cb   :  { %v181_v15 = vadd.f32 %v179_v14, %v157_v12 }
 0x2cd   :  { %184 = vst.msk [vmem:[#allocation3 + $0x8] sm:$0xff] %vm62_vm0, %v181_v15 }
 0x2d0   :  { %v325_v16 = vld [vmem:[#allocation3] sm:$0xff] }
 0x2d1   :  { %543 = vlog2.f32 %v325_v16 }
 0x2d4   :  { %v326_v17 = vld [vmem:[#allocation3 + $0x8] sm:$0xff] }
 0x2d5   :  { %545 = vlog2.f32 %v326_v17 }
 0x2db   :  { %v544_v18 = vpop.eup %543 }
 0x2dc   :  { %v328_v19 = vmul.f32 0.6931472, %v544_v18 }
 0x2de   :  { %v331_v21 = vadd.f32 %v328_v19, %v323_v20 }
 0x2df   :  { %v546_v22 = vpop.eup %545 }
 0x2e0   :  { %v334_v23 = vcombine.high %v331_v21, %v331_v21  ;;  %v341_v24 = vrot.slane %v331_v21, %v747_v13  ;;  %v330_v25 = vmul.f32 0.6931472, %v546_v22 }
 0x2e2   :  { %v348_v27 = vrot.slane %v334_v23, %v747_v13  ;;  %v349_v28 = vcombine.high %v341_v24, %v341_v24  ;;  %v357_v29 = vrot.slane %v341_v24, %v747_v13  ;;  %v332_v30 = vadd.f32 %v330_v25, %v324_v26 }
 0x2e4   :  { %v350_v31 = vcombine.high %v348_v27, %v348_v27  ;;  %v364_v32 = vrot.slane %v348_v27, %v747_v13  ;;  %v371_v33 = vrot.slane %v349_v28, %v747_v13  ;;  %v379_v34 = vcombine.high %v357_v29, %v357_v29  ;;  %392 = vst.msk [vmem:[#allocation11] sm:$0x1] %vm391_vm4, %v357_v29 }
 0x2e5   :  { %v401_v35 = vcombine.high %v332_v30, %v332_v30  ;;  %v408_v36 = vrot.slane %v332_v30, %v747_v13 }
 0x2e6   :  { %v378_v37 = vrot.slane %v350_v31, %v747_v13  ;;  %v380_v38 = vcombine.high %v364_v32, %v364_v32  ;;  %v381_v39 = vcombine.high %v371_v33, %v371_v33  ;;  %393 = vst.msk [vmem:[#allocation11 + $0x2] sm:$0x1] %vm391_vm4, %v371_v33  ;;  %394 = vst.msk [vmem:[#allocation11 + $0x4] sm:$0x1] %vm391_vm4, %v379_v34 }
 0x2e7   :  { %396 = vst.msk [vmem:[#allocation11 + $0x8] sm:$0x1] %vm391_vm4, %v364_v32  ;;  %v415_v40 = vrot.slane %v401_v35, %v747_v13  ;;  %v416_v41 = vcombine.high %v408_v36, %v408_v36  ;;  %v424_v42 = vrot.slane %v408_v36, %v747_v13 }
 0x2e8   :  { %v382_v43 = vcombine.high %v378_v37, %v378_v37  ;;  %395 = vst.msk [vmem:[#allocation11 + $0x6] sm:$0x1] %vm391_vm4, %v381_v39  ;;  %397 = vst.msk [vmem:[#allocation11 + $0xa] sm:$0x1] %vm391_vm4, %v378_v37 }
 0x2e9   :  { %398 = vst.msk [vmem:[#allocation11 + $0xc] sm:$0x1] %vm391_vm4, %v380_v38  ;;  %v417_v44 = vcombine.high %v415_v40, %v415_v40  ;;  %v431_v45 = vrot.slane %v415_v40, %v747_v13  ;;  %v438_v46 = vrot.slane %v416_v41, %v747_v13  ;;  %v446_v47 = vcombine.high %v424_v42, %v424_v42 }
 0x2ea   :  { %458 = vst.msk [vmem:[#allocation11 + $0x1] sm:$0x1] %vm391_vm4, %v424_v42  ;;  %399 = vst.msk [vmem:[#allocation11 + $0xe] sm:$0x1] %vm391_vm4, %v382_v43 }
 0x2eb   :  { %v445_v48 = vrot.slane %v417_v44, %v747_v13  ;;  %v447_v49 = vcombine.high %v431_v45, %v431_v45  ;;  %v448_v50 = vcombine.high %v438_v46, %v438_v46  ;;  %459 = vst.msk [vmem:[#allocation11 + $0x3] sm:$0x1] %vm391_vm4, %v438_v46  ;;  %460 = vst.msk [vmem:[#allocation11 + $0x5] sm:$0x1] %vm391_vm4, %v446_v47 }
 0x2ec   :  { %462 = vst.msk [vmem:[#allocation11 + $0x9] sm:$0x1] %vm391_vm4, %v431_v45 }
 0x2ed   :  { %v449_v51 = vcombine.high %v445_v48, %v445_v48  ;;  %461 = vst.msk [vmem:[#allocation11 + $0x7] sm:$0x1] %vm391_vm4, %v448_v50  ;;  %463 = vst.msk [vmem:[#allocation11 + $0xb] sm:$0x1] %vm391_vm4, %v445_v48 }
 0x2ee   :  { %464 = vst.msk [vmem:[#allocation11 + $0xd] sm:$0x1] %vm391_vm4, %v447_v49 }
 0x2ef   :  { %465 = vst.msk [vmem:[#allocation11 + $0xf] sm:$0x1] %vm391_vm4, %v449_v51 }
 0x2f0   :  { %646 = shalt.err (!%p643_p8)
}
 0x2f1   :  { %s647_s18 = scalar_lea.hbm %s861_s4, 256 }
 0x2f2   :  { %p648_p9 = scmp.ne.s32.totalorder %s861_s4, %s647_s18  ;;  %p651_p10 = scmp.lt.u32.totalorder %s647_s18, %s861_s4 }
 0x2f4   :  { %p653_p11 = pnand %p651_p10, %p648_p9 }
 0x2f6   :  { %656 = shalt.err (!%p653_p11)
}
 0x2f7   :  { %489 = dma.vmem_to_hbm [thread:$0]  %s484_s14, 256, %s861_s4, [#allocation12], %s678_s11, %s678_s11, %s679_s12  }
 0x2f8   :  { %661 = dma.done.wait [#allocation6], 256  }
 0x2f9   :  { %662 = vsyncadd [#allocation6], 4294967040 }
 0x2fa   :  { %663 = dma.done.wait [#allocation12], 256  }
 0x2fb   :  { %664 = vsyncadd [#allocation12], 4294967040 }
 0x2fc   :  { %496 = vsyncpa [#allocation5], 1 }
 0x2fd   :  { %497 = vsyncpa [#allocation8], 1 }
 0x2fe   :  { %498 = vsyncpa [#allocation6], 1 }
 0x2ff   :  { %499 = vsyncpa [#allocation12], 1 }

// kernel: transformer_forward.3
= control target key start
LH: loop header
LB: loop body
LE: loop exit
PB: predicated region body
PF: predicated region fallthrough
CT: control target
= control target key end

     0   :  { %s3764_s0 = inlined_call_operand.hbm [shape: f32[2,8,32], index: 0, kind: input, shape index: {}]   ;;  %s3765_s1 = inlined_call_operand.hbm [shape: f32[8,32], index: 1, kind: input, shape index: {}]   ;;  %s3766_s2 = inlined_call_operand.hbm [shape: bf16[2,32,96], index: 2, kind: input, shape index: {}]   ;;  %s3767_s3 = inlined_call_operand.hbm [shape: f32[2,1,96], index: 3, kind: input, shape index: {}]   ;;  %s3768_s4 = inlined_call_operand.hbm [shape: bf16[2,32,32], index: 4, kind: input, shape index: {}]   ;;  %s3769_s5 = inlined_call_operand.hbm [shape: f32[2,1,32], index: 5, kind: input, shape index: {}]   ;;  %s3770_s6 = inlined_call_operand.hbm [shape: bf16[2,32,64], index: 6, kind: input, shape index: {}]   ;;  %s3771_s7 = inlined_call_operand.hbm [shape: f32[2,1,64], index: 7, kind: input, shape index: {}]   ;;  %s3772_s8 = inlined_call_operand.hbm [shape: bf16[2,64,32], index: 8, kind: input, shape index: {}]   ;;  %s3773_s9 = inlined_call_operand.hbm [shape: f32[2,1,32], index: 9, kind: input, shape index: {}]   ;;  %s3774_s10 = inlined_call_operand.hbm [shape: f32[2,1,32], index: 10, kind: input, shape index: {}]   ;;  %s3775_s11 = inlined_call_operand.hbm [shape: f32[2,1,32], index: 11, kind: input, shape index: {}]   ;;  %s3776_s12 = inlined_call_operand.hbm [shape: f32[2,1,32], index: 12, kind: input, shape index: {}]   ;;  %s3777_s13 = inlined_call_operand.hbm [shape: f32[2,1,32], index: 13, kind: input, shape index: {}]   ;;  %s3778_s14 = inlined_call_operand.hbm [shape: f32[2,8,32], index: 14, kind: output, shape index: {}]  }
   0x1   :  { %3813 = sst [smem:[#allocation34_spill]] %s3764_s0 }
   0x2   :  { %3814 = sst [smem:[#allocation35_spill]] %s3765_s1 }
   0x3   :  { %3815 = sst [smem:[#allocation36_spill]] %s3766_s2 }
   0x4   :  { %3816 = sst [smem:[#allocation37_spill]] %s3767_s3 }
   0x5   :  { %3817 = sst [smem:[#allocation38_spill]] %s3768_s4 }
   0x6   :  { %3818 = sst [smem:[#allocation39_spill]] %s3776_s12 }
   0x7   :  { %3819 = sst [smem:[#allocation40_spill]] %s3777_s13 }
   0x8   :  { %3820 = sst [smem:[#allocation41_spill]] %s3778_s14 }
   0x9   :  { %19 = vsyncpa [#allocation3], 0 }
   0xa   :  { %20 = vsyncpa [#allocation6], 0 }
   0xb   :  { %21 = vsyncpa [#allocation4], 0  ;;  %s3033_s29 = smov 0   ;;  %s3035_s30 = smov 0  }
   0xc   :  { %s3037_s15 = smov 0   ;;  %s3039_s16 = smov 0  }
   0xd   :  { %s3041_s17 = smov 0   ;;  %s3043_s18 = smov 0  }
   0xe LB: > { %3821 = sst [smem:[#allocation24_spill]] %s2911_s30  ;;  %s3062_s19 = sadd.s32 4294967295, %s2927_s18   ;;  %s2927_s18 = sphi %s3043_s18, %s27_s18   ;;  %s2923_s17 = sphi %s3041_s17, %s3881_s17   ;;  %s2919_s16 = sphi %s3039_s16, %s3880_s16   ;;  %s2915_s15 = sphi %s3037_s15, %s3878_s15   ;;  %s2911_s30 = sphi %s3035_s30, %s3877_s30   ;;  %s2907_s29 = sphi %s3033_s29, %s3876_s29  }
   0xf   : > { %3822 = sst [smem:[#allocation25_spill]] %s2915_s15  ;;  %p100_p0 = scmp.ne.s32.totalorder %s2915_s15, %s2911_s30 }
  0x10   : > { %3823 = sst [smem:[#allocation26_spill]] %s2919_s16  ;;  %p101_p1 = scmp.eq.s32.totalorder %s2927_s18, 0 }
  0x11   : > { %3824 = sst [smem:[#allocation27_spill]] %s2927_s18  ;;  %p106_p2 = scmp.ne.s32.totalorder %s2911_s30, %s2907_s29 }
  0x12   : > { %3825 = sst [smem:[#allocation28_spill]] %s3062_s19  ;;  %p3782_p3 = scmp.eq.s32.totalorder %s3062_s19, 0 }
  0x13   : > { %p3070_p4 = por %p101_p1, %p100_p0  ;;  %p2048_p5 = scmp.ge.s32.totalorder %s2927_s18, 1 }
  0x14   : > { %p3077_p6 = por %p3782_p3, %p106_p2  ;;  %p429_p7 = scmp.lt.s32.totalorder %s2927_s18, 3 }
  0x15   : > { %s2929_s24 = smov [#allocation2]   ;;  %p2314_p10 = scmp.lt.s32.totalorder %s2927_s18, 2 }
  0x16   : > { %s3827_s22 = scalar_select %p3077_p6, 1, 0 }
  0x17   : > { %p3082_p8 = pnand %p2048_p5, %p429_p7  ;;  %s444_s25 = sshll.u32 %s2929_s24, 4  ;;  %s3086_s25 = int_to_ptr.vmem [resolvable:$true] %s444_s25 }
  0x18   : > { %3828 = sst [smem:[#allocation29_spill]] %s3827_s22  ;;  %s3099_s28 = sand.u32 1, %s2915_s15  }
  0x19   : > { %s3829_s23 = scalar_select %p3082_p8, 1, 0 }
  0x1a   : > { %p2268_p9 = pneg %p3082_p8  ;;  %p3103_p12 = pnand %p2314_p10, %p3070_p4 }
  0x1b   : > { %3830 = sst [smem:[#allocation30_spill]] %s3829_s23 }
  0x1c   : > { %p3093_p11 = pnand %p2268_p9, %p3782_p3  ;;  %s3834_s0 = sld [smem:[#allocation34_spill]] }
  0x1d   : > { %s3833_s29 = scalar_select %p3103_p12, 1, 0 }
  0x1e   : > { %s3831_s26 = scalar_select %p3093_p11, 1, 0 }
  0x1f   : > { %p3792_p0 = pneg %p3093_p11 }
  0x20   : > { %3832 = sst [smem:[#allocation31_spill]] %s3831_s26 }
  0x22   : > { %s2423_s14 = scalar_lea.hbm %s3834_s0, 256 }
  0x23   : > { %p2424_p13 = scmp.ne.s32.totalorder %s3834_s0, %s2423_s14  ;;  %p2430_p4 = scmp.lt.u32.totalorder %s2423_s14, %s3834_s0 }
  0x25   : > { %p2426_p1 = pnand %p3792_p0, %p2424_p13 }
  0x27   : > { %p2427_p2 = pneg %p2426_p1 }
  0x29   : > { %p2432_p5 = pnand %p2430_p4, %p2427_p2 }
  0x2b   : > { %2435 = shalt.err (!%p2432_p5)
}
  0x2c   : > { %s2436_s20 = scalar_lea.vmem %s3086_s25, 256  ;;  %p2444_p3 = scmp.lt.s32.totalorder %s3086_s25, %s3086_s25 }
  0x2d   : > { %p2437_p7 = scmp.ne.s32.totalorder %s3086_s25, %s2436_s20  ;;  %p2445_p13 = scmp.lt.s32.totalorder %s2436_s20, %s2436_s20 }
  0x2f   : > { %p2439_p9 = pnand %p2437_p7, %p3792_p0  ;;  %p2446_p1 = por %p2445_p13, %p2444_p3 }
  0x31   : > { %p2440_p10 = pneg %p2439_p9 }
  0x33   : > { %p2447_p6 = pnand %p2446_p1, %p2440_p10 }
  0x35   : > { %2450 = shalt.err (!%p2447_p6)
}
  0x36   : > { %s2930_s16 = smov 128   ;;  %s2931_s14 = smov 8  }
  0x37   : > { %2271 = dma.hbm_to_vmem [thread:$0]  (!%p3093_p11), %s3834_s0, 256, %s3086_s25, [#allocation3], %s2930_s16, %s2930_s16, %s2931_s14  }
  0x38   : > { %s3135_s24 = sshll.u32 %s3099_s28, 4  ;;  %s36_s21 = sadd.s32 1, %s2923_s17 }
  0x39   : > { %p37_p3 = scmp.ge.s32.totalorder %s36_s21, 2  ;;  %s3139_s20 = sshll.u32 %s2923_s17, 8 }
  0x3a   : > { %s3835_s2 = sld [smem:[#allocation36_spill]]  ;;  %s473_s13 = scalar_lea.vmem [#allocation7], %s3135_s24 }
  0x3b   : > { %s480_s22 = sshll.u32 %s473_s13, 4  ;;  %s3883_s21 = smov (%p37_p3, %s36_s21), 0  ;;  %s3150_s22 = int_to_ptr.vmem [resolvable:$true] %s480_s22 }
  0x3c   : > { %3836 = sst [smem:[#allocation32_spill]] %s3883_s21  ;;  %s90_s25 = ssub.s32 %s2923_s17, %s3883_s21 }
  0x3d   : > { %p3154_p6 = scmp.eq.s32.totalorder %s90_s25, 0  ;;  %s3838_s14 = sand.u32 1, %s2927_s18  }
  0x3e   : > { %s3160_s30 = scalar_lea.sflag [#allocation3], %s3838_s14  ;;  %p3166_p4 = pneg %p3103_p12 }
  0x3f   : > { %s3837_s16 = scalar_select %p3154_p6, 1, 0 }
  0x40   : > { %s3145_s23 = scalar_lea.hbm %s3835_s2, %s3139_s20  ;;  %s2456_s25 = scalar_lea.hbm %s3835_s2, 512 }
  0x41   : > { %s2451_s19 = scalar_lea.hbm %s3145_s23, 256  ;;  %p2457_p9 = scmp.lt.u32.totalorder %s3145_s23, %s3835_s2 }
  0x42   : > { %p2452_p2 = scmp.ne.s32.totalorder %s3145_s23, %s2451_s19  ;;  %p2458_p10 = scmp.lt.u32.totalorder %s2456_s25, %s2451_s19 }
  0x43   : > { %s3839_s27 = scalar_select %p3166_p4, 1, 0 }
  0x44   : > { %p2454_p5 = pnand %p3166_p4, %p2452_p2  ;;  %p2459_p13 = por %p2458_p10, %p2457_p9 }
  0x45   : > { %p2460_p1 = scmp.lt.u32.totalorder %s2451_s19, %s3145_s23 }
  0x46   : > { %p2455_p7 = pneg %p2454_p5 }
  0x47   : > { %p2461_p3 = por %p2460_p1, %p2459_p13 }
  0x49   : > { %p2462_p0 = pnand %p2461_p3, %p2455_p7 }
  0x4b   : > { %2465 = shalt.err (!%p2462_p0)
}
  0x4c   : > { %s2466_s14 = scalar_lea.vmem %s3150_s22, 256  ;;  %s2932_s0 = smov [#allocation7]  }
  0x4d   : > { %p2467_p2 = scmp.ne.s32.totalorder %s3150_s22, %s2466_s14  ;;  %s2471_s13 = sshll.u32 %s2932_s0, 4  ;;  %s2472_s13 = int_to_ptr.vmem [resolvable:$false] %s2471_s13 }
  0x4e   : > { %s2473_s1 = scalar_lea.vmem %s2472_s13, 512  ;;  %p2474_p11 = scmp.lt.s32.totalorder %s3150_s22, %s2472_s13 }
  0x4f   : > { %p2469_p5 = pnand %p2467_p2, %p3166_p4  ;;  %p2475_p6 = scmp.lt.s32.totalorder %s2473_s1, %s2466_s14 }
  0x51   : > { %p2470_p8 = pneg %p2469_p5  ;;  %p2476_p9 = por %p2475_p6, %p2474_p11 }
  0x53   : > { %p2477_p10 = pnand %p2476_p9, %p2470_p8 }
  0x55   : > { %2480 = shalt.err (!%p2477_p10)
}
  0x56   : > { %s3800_s21 = smov 64   ;;  %s3804_s19 = smov 4  }
  0x57   : > { %2278 = dma.hbm_to_vmem [thread:$0]  (!%p3103_p12), %s3145_s23, 256, %s3150_s22, %s3160_s30, %s3800_s21, %s3800_s21, %s3804_s19  }
  0x58   : > { %s3840_s25 = sadd.s32 1, %s2915_s15  ;;  %p3841_p8 = scmp.ne.s32.totalorder %s3837_s16, 0 }
  0x59   : > { %s3201_s0 = sshll.u32 %s2923_s17, 4  ;;  %s493_s13 = scalar_lea.vmem [#allocation8], %s3099_s28 }
  0x5a   : > { %s3198_s14 = scalar_select %p3841_p8, %s2915_s15, %s3840_s25  }
  0x5b   : > { %s500_s1 = sshll.u32 %s493_s13, 4  ;;  %s3843_s3 = sld [smem:[#allocation37_spill]]  ;;  %s501_s1 = int_to_ptr.vmem [resolvable:$true] %s500_s1 }
  0x5c   : > { %3842 = sst [smem:[#allocation33_spill]] %s3198_s14 }
  0x61   : > { %s498_s26 = scalar_lea.hbm %s3843_s3, %s3201_s0  ;;  %s2486_s16 = scalar_lea.hbm %s3843_s3, 32 }
  0x62   : > { %s2481_s12 = scalar_lea.hbm %s498_s26, 16  ;;  %p2487_p7 = scmp.lt.u32.totalorder %s498_s26, %s3843_s3 }
  0x63   : > { %p2482_p11 = scmp.ne.s32.totalorder %s498_s26, %s2481_s12  ;;  %p2488_p13 = scmp.lt.u32.totalorder %s2486_s16, %s2481_s12 }
  0x64   : > { %p2490_p3 = scmp.lt.u32.totalorder %s2481_s12, %s498_s26 }
  0x65   : > { %p2484_p0 = pnand %p2482_p11, %p3166_p4  ;;  %p2489_p1 = por %p2488_p13, %p2487_p7 }
  0x67   : > { %p2485_p6 = pneg %p2484_p0  ;;  %p2491_p2 = por %p2490_p3, %p2489_p1 }
  0x69   : > { %p2492_p5 = pnand %p2491_p2, %p2485_p6 }
  0x6b   : > { %2495 = shalt.err (!%p2492_p5)
}
  0x6c   : > { %s2496_s2 = scalar_lea.vmem %s501_s1, 16  ;;  %s2935_s18 = smov [#allocation8]  }
  0x6d   : > { %p2497_p9 = scmp.ne.s32.totalorder %s501_s1, %s2496_s2  ;;  %s2501_s13 = sshll.u32 %s2935_s18, 4  ;;  %s2502_s13 = int_to_ptr.vmem [resolvable:$false] %s2501_s13 }
  0x6e   : > { %s2503_s23 = scalar_lea.vmem %s2502_s13, 32  ;;  %p2504_p11 = scmp.lt.s32.totalorder %s501_s1, %s2502_s13 }
  0x6f   : > { %p2499_p10 = pnand %p2497_p9, %p3166_p4  ;;  %p2505_p0 = scmp.lt.s32.totalorder %s2503_s23, %s2496_s2 }
  0x71   : > { %p2500_p8 = pneg %p2499_p10  ;;  %p2506_p12 = por %p2505_p0, %p2504_p11 }
  0x73   : > { %p2507_p7 = pnand %p2506_p12, %p2500_p8 }
  0x75   : > { %2510 = shalt.err (!%p2507_p7)
}
  0x76   : > { %p3844_p13 = scmp.ne.s32.totalorder %s3833_s29, 0  ;;  %s3845_s4 = sld [smem:[#allocation38_spill]] }
  0x77   : > { %s511_s16 = scalar_lea.vmem [#allocation9], %s3135_s24  ;;  %s3234_s13 = scalar_lea.hbm %s3769_s5, %s3201_s0 }
  0x78   : > { %2281 = dma.hbm_to_vmem [thread:$0]  (!%p3844_p13), %s498_s26, 16, %s501_s1, %s3160_s30  }
  0x79   : > { %s518_s25 = sshll.u32 %s511_s16, 4  ;;  %s3228_s25 = int_to_ptr.vmem [resolvable:$true] %s518_s25 }
  0x7c   : > { %s3225_s22 = scalar_lea.hbm %s3845_s4, %s3139_s20  ;;  %s2516_s12 = scalar_lea.hbm %s3845_s4, 512 }
  0x7d   : > { %s2511_s23 = scalar_lea.hbm %s3225_s22, 256  ;;  %p2517_p3 = scmp.lt.u32.totalorder %s3225_s22, %s3845_s4 }
  0x7e   : > { %p2512_p12 = scmp.ne.s32.totalorder %s3225_s22, %s2511_s23  ;;  %p2518_p2 = scmp.lt.u32.totalorder %s2516_s12, %s2511_s23 }
  0x7f   : > { %p2520_p9 = scmp.lt.u32.totalorder %s2511_s23, %s3225_s22 }
  0x80   : > { %p2514_p6 = pnand %p2512_p12, %p3166_p4  ;;  %p2519_p5 = por %p2518_p2, %p2517_p3 }
  0x82   : > { %p2515_p1 = pneg %p2514_p6  ;;  %p2521_p10 = por %p2520_p9, %p2519_p5 }
  0x84   : > { %p2522_p8 = pnand %p2521_p10, %p2515_p1 }
  0x86   : > { %2525 = shalt.err (!%p2522_p8)
}
  0x87   : > { %s2526_s16 = scalar_lea.vmem %s3228_s25, 256  ;;  %s2936_s2 = smov [#allocation9]  }
  0x88   : > { %p2527_p11 = scmp.ne.s32.totalorder %s3228_s25, %s2526_s16  ;;  %s2531_s18 = sshll.u32 %s2936_s2, 4  ;;  %s2532_s18 = int_to_ptr.vmem [resolvable:$false] %s2531_s18 }
  0x89   : > { %s2533_s19 = scalar_lea.vmem %s2532_s18, 512  ;;  %p2534_p12 = scmp.lt.s32.totalorder %s3228_s25, %s2532_s18 }
  0x8a   : > { %p2529_p0 = pnand %p2527_p11, %p3166_p4  ;;  %p2535_p6 = scmp.lt.s32.totalorder %s2533_s19, %s2526_s16 }
  0x8c   : > { %p2530_p7 = pneg %p2529_p0  ;;  %p2536_p3 = por %p2535_p6, %p2534_p12 }
  0x8e   : > { %p2537_p2 = pnand %p2536_p3, %p2530_p7 }
  0x90   : > { %2540 = shalt.err (!%p2537_p2)
}
  0x91   : > { %s3846_s23 = smov 4   ;;  %s3847_s26 = smov 64  }
  0x92   : > { %2284 = dma.hbm_to_vmem [thread:$0]  (!%p3844_p13), %s3225_s22, 256, %s3228_s25, %s3160_s30, %s3847_s26, %s3847_s26, %s3846_s23  }
  0x93   : > { %s531_s1 = scalar_lea.vmem [#allocation10], %s3099_s28  ;;  %s3266_s2 = scalar_lea.hbm %s3770_s6, %s3139_s20 }
  0x94   : > { %s538_s12 = sshll.u32 %s531_s1, 4  ;;  %s2541_s18 = scalar_lea.hbm %s3234_s13, 16  ;;  %s539_s12 = int_to_ptr.vmem [resolvable:$true] %s538_s12 }
  0x95   : > { %p2542_p1 = scmp.ne.s32.totalorder %s3234_s13, %s2541_s18  ;;  %s2546_s4 = scalar_lea.hbm %s3769_s5, 32 }
  0x96   : > { %p2547_p10 = scmp.lt.u32.totalorder %s3234_s13, %s3769_s5  ;;  %p2548_p8 = scmp.lt.u32.totalorder %s2546_s4, %s2541_s18 }
  0x97   : > { %p2544_p5 = pnand %p2542_p1, %p3166_p4  ;;  %p2550_p0 = scmp.lt.u32.totalorder %s2541_s18, %s3234_s13 }
  0x98   : > { %p2549_p11 = por %p2548_p8, %p2547_p10 }
  0x99   : > { %p2545_p9 = pneg %p2544_p5 }
  0x9a   : > { %p2551_p7 = por %p2550_p0, %p2549_p11 }
  0x9c   : > { %p2552_p12 = pnand %p2551_p7, %p2545_p9 }
  0x9e   : > { %2555 = shalt.err (!%p2552_p12)
}
  0x9f   : > { %s2556_s20 = scalar_lea.vmem %s539_s12, 16  ;;  %s2937_s22 = smov [#allocation10]  }
  0xa0   : > { %p2557_p6 = scmp.ne.s32.totalorder %s539_s12, %s2556_s20  ;;  %s2561_s25 = sshll.u32 %s2937_s22, 4  ;;  %s2562_s25 = int_to_ptr.vmem [resolvable:$false] %s2561_s25 }
  0xa1   : > { %s2563_s3 = scalar_lea.vmem %s2562_s25, 32  ;;  %p2564_p1 = scmp.lt.s32.totalorder %s539_s12, %s2562_s25 }
  0xa2   : > { %p2559_p3 = pnand %p2557_p6, %p3166_p4  ;;  %p2565_p5 = scmp.lt.s32.totalorder %s2563_s3, %s2556_s20 }
  0xa4   : > { %p2560_p2 = pneg %p2559_p3  ;;  %p2566_p13 = por %p2565_p5, %p2564_p1 }
  0xa6   : > { %p2567_p8 = pnand %p2566_p13, %p2560_p2 }
  0xa8   : > { %2570 = shalt.err (!%p2567_p8)
}
  0xa9   : > { %p3848_p10 = scmp.ne.s32.totalorder %s3833_s29, 0  ;;  %s549_s4 = scalar_lea.vmem [#allocation11], %s3135_s24 }
  0xaa   : > { %s556_s15 = sshll.u32 %s549_s4, 4  ;;  %s3293_s21 = scalar_lea.hbm %s3771_s7, %s3201_s0  ;;  %s3287_s15 = int_to_ptr.vmem [resolvable:$true] %s556_s15 }
  0xab   : > { %2287 = dma.hbm_to_vmem [thread:$0]  (!%p3848_p10), %s3234_s13, 16, %s539_s12, %s3160_s30  }
  0xac   : > { %s2571_s16 = scalar_lea.hbm %s3266_s2, 256  ;;  %s2576_s20 = scalar_lea.hbm %s3770_s6, 512 }
  0xad   : > { %p2572_p13 = scmp.ne.s32.totalorder %s3266_s2, %s2571_s16  ;;  %p2577_p0 = scmp.lt.u32.totalorder %s3266_s2, %s3770_s6 }
  0xae   : > { %p2578_p7 = scmp.lt.u32.totalorder %s2576_s20, %s2571_s16  ;;  %p2580_p6 = scmp.lt.u32.totalorder %s2571_s16, %s3266_s2 }
  0xaf   : > { %p2574_p9 = pnand %p2572_p13, %p3166_p4 }
  0xb0   : > { %p2579_p12 = por %p2578_p7, %p2577_p0 }
  0xb1   : > { %p2575_p11 = pneg %p2574_p9 }
  0xb2   : > { %p2581_p3 = por %p2580_p6, %p2579_p12 }
  0xb4   : > { %p2582_p2 = pnand %p2581_p3, %p2575_p11 }
  0xb6   : > { %2585 = shalt.err (!%p2582_p2)
}
  0xb7   : > { %s2586_s24 = scalar_lea.vmem %s3287_s15, 256  ;;  %s2938_s12 = smov [#allocation11]  }
  0xb8   : > { %p2587_p1 = scmp.ne.s32.totalorder %s3287_s15, %s2586_s24  ;;  %s2591_s25 = sshll.u32 %s2938_s12, 4  ;;  %s2592_s25 = int_to_ptr.vmem [resolvable:$false] %s2591_s25 }
  0xb9   : > { %s2593_s3 = scalar_lea.vmem %s2592_s25, 512  ;;  %p2594_p13 = scmp.lt.s32.totalorder %s3287_s15, %s2592_s25 }
  0xba   : > { %p2589_p5 = pnand %p2587_p1, %p3166_p4  ;;  %p2595_p9 = scmp.lt.s32.totalorder %s2593_s3, %s2586_s24 }
  0xbc   : > { %p2590_p8 = pneg %p2589_p5  ;;  %p2596_p0 = por %p2595_p9, %p2594_p13 }
  0xbe   : > { %p2597_p7 = pnand %p2596_p0, %p2590_p8 }
  0xc0   : > { %2600 = shalt.err (!%p2597_p7)
}
  0xc1   : > { %2290 = dma.hbm_to_vmem [thread:$0]  (!%p3848_p10), %s3266_s2, 256, %s3287_s15, %s3160_s30, %s3847_s26, %s3847_s26, %s3846_s23  }
  0xc2   : > { %s569_s4 = scalar_lea.vmem [#allocation12], %s3099_s28  ;;  %s2064_s1 = sshll.u32 %s3099_s28, 5 }
  0xc3   : > { %s576_s14 = sshll.u32 %s569_s4, 4  ;;  %s2601_s16 = scalar_lea.hbm %s3293_s21, 16  ;;  %s577_s14 = int_to_ptr.vmem [resolvable:$true] %s576_s14 }
  0xc4   : > { %p2602_p11 = scmp.ne.s32.totalorder %s3293_s21, %s2601_s16  ;;  %s2606_s20 = scalar_lea.hbm %s3771_s7, 32 }
  0xc5   : > { %p2607_p3 = scmp.lt.u32.totalorder %s3293_s21, %s3771_s7  ;;  %p2608_p2 = scmp.lt.u32.totalorder %s2606_s20, %s2601_s16 }
  0xc6   : > { %p2604_p12 = pnand %p2602_p11, %p3166_p4  ;;  %p2610_p5 = scmp.lt.u32.totalorder %s2601_s16, %s3293_s21 }
  0xc7   : > { %p2609_p1 = por %p2608_p2, %p2607_p3 }
  0xc8   : > { %p2605_p6 = pneg %p2604_p12 }
  0xc9   : > { %p2611_p8 = por %p2610_p5, %p2609_p1 }
  0xcb   : > { %p2612_p13 = pnand %p2611_p8, %p2605_p6 }
  0xcd   : > { %2615 = shalt.err (!%p2612_p13)
}
  0xce   : > { %s2616_s2 = scalar_lea.vmem %s577_s14, 16  ;;  %s2939_s15 = smov [#allocation12]  }
  0xcf   : > { %p2617_p9 = scmp.ne.s32.totalorder %s577_s14, %s2616_s2  ;;  %s2621_s24 = sshll.u32 %s2939_s15, 4  ;;  %s2622_s24 = int_to_ptr.vmem [resolvable:$false] %s2621_s24 }
  0xd0   : > { %s2623_s12 = scalar_lea.vmem %s2622_s24, 32  ;;  %p2624_p11 = scmp.lt.s32.totalorder %s577_s14, %s2622_s24 }
  0xd1   : > { %p2619_p0 = pnand %p2617_p9, %p3166_p4  ;;  %p2625_p12 = scmp.lt.s32.totalorder %s2623_s12, %s2616_s2 }
  0xd3   : > { %p2620_p7 = pneg %p2619_p0  ;;  %p2626_p10 = por %p2625_p12, %p2624_p11 }
  0xd5   : > { %p2627_p2 = pnand %p2626_p10, %p2620_p7 }
  0xd7   : > { %2630 = shalt.err (!%p2627_p2)
}
  0xd8   : > { %p3849_p3 = scmp.ne.s32.totalorder %s3833_s29, 0  ;;  %s2117_s25 = sshll.u32 %s2923_s17, 9 }
  0xd9   : > { %s587_s3 = scalar_lea.vmem [#allocation13], %s2064_s1  ;;  %s3346_s19 = scalar_lea.hbm %s3772_s8, %s2117_s25 }
  0xda   : > { %2293 = dma.hbm_to_vmem [thread:$0]  (!%p3849_p3), %s3293_s21, 16, %s577_s14, %s3160_s30  }
  0xdb   : > { %s594_s4 = sshll.u32 %s587_s3, 4  ;;  %s2631_s20 = scalar_lea.hbm %s3346_s19, 512  ;;  %s3348_s4 = int_to_ptr.vmem [resolvable:$true] %s594_s4 }
  0xdc   : > { %p2632_p10 = scmp.ne.s32.totalorder %s3346_s19, %s2631_s20  ;;  %s2636_s1 = scalar_lea.hbm %s3772_s8, 1024 }
  0xdd   : > { %p2637_p5 = scmp.lt.u32.totalorder %s3346_s19, %s3772_s8  ;;  %p2638_p8 = scmp.lt.u32.totalorder %s2636_s1, %s2631_s20 }
  0xde   : > { %p2634_p6 = pnand %p2632_p10, %p3166_p4  ;;  %p2640_p9 = scmp.lt.u32.totalorder %s2631_s20, %s3346_s19 }
  0xdf   : > { %p2639_p13 = por %p2638_p8, %p2637_p5 }
  0xe0   : > { %p2635_p1 = pneg %p2634_p6 }
  0xe1   : > { %p2641_p0 = por %p2640_p9, %p2639_p13 }
  0xe3   : > { %p2642_p7 = pnand %p2641_p0, %p2635_p1 }
  0xe5   : > { %2645 = shalt.err (!%p2642_p7)
}
  0xe6   : > { %s2646_s2 = scalar_lea.vmem %s3348_s4, 512  ;;  %s2940_s15 = smov [#allocation13]  }
  0xe7   : > { %p2647_p11 = scmp.ne.s32.totalorder %s3348_s4, %s2646_s2  ;;  %s2651_s24 = sshll.u32 %s2940_s15, 4  ;;  %s2652_s24 = int_to_ptr.vmem [resolvable:$false] %s2651_s24 }
  0xe8   : > { %s2653_s12 = scalar_lea.vmem %s2652_s24, 1024  ;;  %p2654_p10 = scmp.lt.s32.totalorder %s3348_s4, %s2652_s24 }
  0xe9   : > { %p2649_p12 = pnand %p2647_p11, %p3166_p4  ;;  %p2655_p6 = scmp.lt.s32.totalorder %s2653_s12, %s2646_s2 }
  0xeb   : > { %p2650_p2 = pneg %p2649_p12  ;;  %p2656_p5 = por %p2655_p6, %p2654_p10 }
  0xed   : > { %p2657_p8 = pnand %p2656_p5, %p2650_p2 }
  0xef   : > { %2660 = shalt.err (!%p2657_p8)
}
  0xf0   : > { %2296 = dma.hbm_to_vmem [thread:$0]  (!%p3849_p3), %s3346_s19, 512, %s3348_s4, %s3160_s30, %s3847_s26, %s3847_s26, %s3846_s23  }
  0xf1   : > { %s3379_s16 = scalar_lea.hbm %s3773_s9, %s3201_s0  ;;  %s607_s18 = scalar_lea.vmem [#allocation14], %s3099_s28 }
  0xf2   : > { %s614_s20 = sshll.u32 %s607_s18, 4  ;;  %s3386_s1 = scalar_lea.hbm %s3774_s10, %s3201_s0  ;;  %s615_s20 = int_to_ptr.vmem [resolvable:$true] %s614_s20 }
  0xf3   : > { %s2661_s22 = scalar_lea.hbm %s3379_s16, 16  ;;  %s2666_s4 = scalar_lea.hbm %s3773_s9, 32 }
  0xf4   : > { %p2662_p1 = scmp.ne.s32.totalorder %s3379_s16, %s2661_s22  ;;  %p2667_p0 = scmp.lt.u32.totalorder %s3379_s16, %s3773_s9 }
  0xf5   : > { %p2668_p7 = scmp.lt.u32.totalorder %s2666_s4, %s2661_s22  ;;  %p2670_p12 = scmp.lt.u32.totalorder %s2661_s22, %s3379_s16 }
  0xf6   : > { %p2664_p13 = pnand %p2662_p1, %p3166_p4 }
  0xf7   : > { %p2669_p11 = por %p2668_p7, %p2667_p0 }
  0xf8   : > { %p2665_p9 = pneg %p2664_p13 }
  0xf9   : > { %p2671_p2 = por %p2670_p12, %p2669_p11 }
  0xfb   : > { %p2672_p10 = pnand %p2671_p2, %p2665_p9 }
  0xfd   : > { %2675 = shalt.err (!%p2672_p10)
}
  0xfe   : > { %s2676_s2 = scalar_lea.vmem %s615_s20, 16  ;;  %s2941_s15 = smov [#allocation14]  }
  0xff   : > { %p2677_p6 = scmp.ne.s32.totalorder %s615_s20, %s2676_s2  ;;  %s2681_s24 = sshll.u32 %s2941_s15, 4  ;;  %s2682_s24 = int_to_ptr.vmem [resolvable:$false] %s2681_s24 }
 0x100   : > { %s2683_s12 = scalar_lea.vmem %s2682_s24, 32  ;;  %p2684_p1 = scmp.lt.s32.totalorder %s615_s20, %s2682_s24 }
 0x101   : > { %p2679_p5 = pnand %p2677_p6, %p3166_p4  ;;  %p2685_p13 = scmp.lt.s32.totalorder %s2683_s12, %s2676_s2 }
 0x103   : > { %p2680_p8 = pneg %p2679_p5  ;;  %p2686_p3 = por %p2685_p13, %p2684_p1 }
 0x105   : > { %p2687_p0 = pnand %p2686_p3, %p2680_p8 }
 0x107   : > { %2690 = shalt.err (!%p2687_p0)
}
 0x108   : > { %p3850_p7 = scmp.ne.s32.totalorder %s3833_s29, 0  ;;  %s624_s25 = scalar_lea.vmem [#allocation15], %s3099_s28 }
 0x109   : > { %s631_s3 = sshll.u32 %s624_s25, 4  ;;  %s3411_s14 = scalar_lea.hbm %s3775_s11, %s3201_s0  ;;  %s632_s3 = int_to_ptr.vmem [resolvable:$true] %s631_s3 }
 0x10a   : > { %2299 = dma.hbm_to_vmem [thread:$0]  (!%p3850_p7), %s3379_s16, 16, %s615_s20, %s3160_s30  }
 0x10b   : > { %s2691_s22 = scalar_lea.hbm %s3386_s1, 16  ;;  %s2696_s4 = scalar_lea.hbm %s3774_s10, 32 }
 0x10c   : > { %p2692_p3 = scmp.ne.s32.totalorder %s3386_s1, %s2691_s22  ;;  %p2697_p12 = scmp.lt.u32.totalorder %s3386_s1, %s3774_s10 }
 0x10d   : > { %p2698_p2 = scmp.lt.u32.totalorder %s2696_s4, %s2691_s22  ;;  %p2700_p6 = scmp.lt.u32.totalorder %s2691_s22, %s3386_s1 }
 0x10e   : > { %p2694_p9 = pnand %p2692_p3, %p3166_p4 }
 0x10f   : > { %p2699_p10 = por %p2698_p2, %p2697_p12 }
 0x110   : > { %p2695_p11 = pneg %p2694_p9 }
 0x111   : > { %p2701_p5 = por %p2700_p6, %p2699_p10 }
 0x113   : > { %p2702_p8 = pnand %p2701_p5, %p2695_p11 }
 0x115   : > { %2705 = shalt.err (!%p2702_p8)
}
 0x116   : > { %s2706_s16 = scalar_lea.vmem %s632_s3, 16  ;;  %s2942_s20 = smov [#allocation15]  }
 0x117   : > { %p2707_p1 = scmp.ne.s32.totalorder %s632_s3, %s2706_s16  ;;  %s2711_s2 = sshll.u32 %s2942_s20, 4  ;;  %s2712_s2 = int_to_ptr.vmem [resolvable:$false] %s2711_s2 }
 0x118   : > { %s2713_s15 = scalar_lea.vmem %s2712_s2, 32  ;;  %p2714_p3 = scmp.lt.s32.totalorder %s632_s3, %s2712_s2 }
 0x119   : > { %p2709_p13 = pnand %p2707_p1, %p3166_p4  ;;  %p2715_p9 = scmp.lt.s32.totalorder %s2713_s15, %s2706_s16 }
 0x11b   : > { %p2710_p0 = pneg %p2709_p13  ;;  %p2716_p7 = por %p2715_p9, %p2714_p3 }
 0x11d   : > { %p2717_p2 = pnand %p2716_p7, %p2710_p0 }
 0x11f   : > { %2720 = shalt.err (!%p2717_p2)
}
 0x120   : > { %p3851_p12 = scmp.ne.s32.totalorder %s3833_s29, 0  ;;  %s641_s24 = scalar_lea.vmem [#allocation16], %s3099_s28 }
 0x121   : > { %s648_s12 = sshll.u32 %s641_s24, 4  ;;  %s3852_s21 = sld [smem:[#allocation39_spill]]  ;;  %s649_s12 = int_to_ptr.vmem [resolvable:$true] %s648_s12 }
 0x122   : > { %2302 = dma.hbm_to_vmem [thread:$0]  (!%p3851_p12), %s3386_s1, 16, %s632_s3, %s3160_s30  }
 0x123   : > { %s2721_s23 = scalar_lea.hbm %s3411_s14, 16  ;;  %s2726_s19 = scalar_lea.hbm %s3775_s11, 32 }
 0x124   : > { %p2722_p7 = scmp.ne.s32.totalorder %s3411_s14, %s2721_s23  ;;  %p2727_p6 = scmp.lt.u32.totalorder %s3411_s14, %s3775_s11 }
 0x125   : > { %p2728_p5 = scmp.lt.u32.totalorder %s2726_s19, %s2721_s23  ;;  %p2730_p1 = scmp.lt.u32.totalorder %s2721_s23, %s3411_s14 }
 0x126   : > { %p2724_p11 = pnand %p2722_p7, %p3166_p4 }
 0x127   : > { %s3436_s22 = scalar_lea.hbm %s3852_s21, %s3201_s0  ;;  %p2729_p8 = por %p2728_p5, %p2727_p6 }
 0x128   : > { %p2725_p10 = pneg %p2724_p11 }
 0x129   : > { %p2731_p13 = por %p2730_p1, %p2729_p8 }
 0x12b   : > { %p2732_p0 = pnand %p2731_p13, %p2725_p10 }
 0x12d   : > { %2735 = shalt.err (!%p2732_p0)
}
 0x12e   : > { %s2736_s1 = scalar_lea.vmem %s649_s12, 16  ;;  %s2943_s3 = smov [#allocation16]  }
 0x12f   : > { %p2737_p3 = scmp.ne.s32.totalorder %s649_s12, %s2736_s1  ;;  %s2741_s20 = sshll.u32 %s2943_s3, 4  ;;  %s2742_s20 = int_to_ptr.vmem [resolvable:$false] %s2741_s20 }
 0x130   : > { %s2743_s2 = scalar_lea.vmem %s2742_s20, 32  ;;  %p2744_p7 = scmp.lt.s32.totalorder %s649_s12, %s2742_s20 }
 0x131   : > { %p2739_p9 = pnand %p2737_p3, %p3166_p4  ;;  %p2745_p11 = scmp.lt.s32.totalorder %s2743_s2, %s2736_s1 }
 0x133   : > { %p2740_p2 = pneg %p2739_p9  ;;  %p2746_p12 = por %p2745_p11, %p2744_p7 }
 0x135   : > { %p2747_p5 = pnand %p2746_p12, %p2740_p2 }
 0x137   : > { %2750 = shalt.err (!%p2747_p5)
}
 0x138   : > { %p3853_p6 = scmp.ne.s32.totalorder %s3833_s29, 0  ;;  %s658_s15 = scalar_lea.vmem [#allocation17], %s3099_s28 }
 0x139   : > { %s665_s24 = sshll.u32 %s658_s15, 4  ;;  %s2944_s25 = smov [#allocation5]   ;;  %s3457_s24 = int_to_ptr.vmem [resolvable:$true] %s665_s24 }
 0x13a   : > { %2305 = dma.hbm_to_vmem [thread:$0]  (!%p3853_p6), %s3411_s14, 16, %s649_s12, %s3160_s30  }
 0x13b   : > { %s458_s18 = sshll.u32 %s2944_s25, 4  ;;  %s2751_s23 = scalar_lea.hbm %s3436_s22, 16  ;;  %s459_s18 = int_to_ptr.vmem [resolvable:$true] %s458_s18 }
 0x13c   : > { %p2752_p12 = scmp.ne.s32.totalorder %s3436_s22, %s2751_s23  ;;  %s2756_s19 = scalar_lea.hbm %s3852_s21, 32 }
 0x13d   : > { %p2757_p1 = scmp.lt.u32.totalorder %s3436_s22, %s3852_s21  ;;  %p2758_p13 = scmp.lt.u32.totalorder %s2756_s19, %s2751_s23 }
 0x13e   : > { %p2754_p10 = pnand %p2752_p12, %p3166_p4  ;;  %p2760_p3 = scmp.lt.u32.totalorder %s2751_s23, %s3436_s22 }
 0x13f   : > { %p2759_p0 = por %p2758_p13, %p2757_p1 }
 0x140   : > { %p2755_p8 = pneg %p2754_p10 }
 0x141   : > { %p2761_p9 = por %p2760_p3, %p2759_p0 }
 0x143   : > { %p2762_p2 = pnand %p2761_p9, %p2755_p8 }
 0x145   : > { %2765 = shalt.err (!%p2762_p2)
}
 0x146   : > { %s2766_s14 = scalar_lea.vmem %s3457_s24, 16  ;;  %s2945_s12 = smov [#allocation17]  }
 0x147   : > { %p2767_p7 = scmp.ne.s32.totalorder %s3457_s24, %s2766_s14  ;;  %s2771_s1 = sshll.u32 %s2945_s12, 4  ;;  %s2772_s1 = int_to_ptr.vmem [resolvable:$false] %s2771_s1 }
 0x148   : > { %s2773_s3 = scalar_lea.vmem %s2772_s1, 32  ;;  %p2774_p12 = scmp.lt.s32.totalorder %s3457_s24, %s2772_s1 }
 0x149   : > { %p2769_p11 = pnand %p2767_p7, %p3166_p4  ;;  %p2775_p10 = scmp.lt.s32.totalorder %s2773_s3, %s2766_s14 }
 0x14b   : > { %p2770_p5 = pneg %p2769_p11  ;;  %p2776_p1 = por %p2775_p10, %p2774_p12 }
 0x14d   : > { %p2777_p13 = pnand %p2776_p1, %p2770_p5 }
 0x14f   : > { %2780 = shalt.err (!%p2777_p13)
}
 0x150   : > { %s3854_s20 = sld [smem:[#allocation31_spill]] }
 0x151   : > { %2308 = dma.hbm_to_vmem [thread:$0]  (!%p3853_p6), %s3436_s22, 16, %s3457_s24, %s3160_s30  }
 0x152   : > { %s3855_s25 = sld [smem:[#allocation35_spill]] }
 0x156   : > { %p3856_p0 = scmp.ne.s32.totalorder %s3854_s20, 0 }
 0x158   : > { %s2781_s23 = scalar_lea.hbm %s3855_s25, 128  ;;  %p3857_p3 = pneg %p3856_p0 }
 0x159   : > { %p2782_p8 = scmp.ne.s32.totalorder %s3855_s25, %s2781_s23  ;;  %p2788_p7 = scmp.lt.u32.totalorder %s2781_s23, %s3855_s25 }
 0x15b   : > { %p2784_p9 = pnand %p2782_p8, %p3857_p3 }
 0x15d   : > { %p2785_p2 = pneg %p2784_p9 }
 0x15f   : > { %p2790_p11 = pnand %p2788_p7, %p2785_p2 }
 0x161   : > { %2793 = shalt.err (!%p2790_p11)
}
 0x162   : > { %s2794_s22 = scalar_lea.vmem %s459_s18, 128  ;;  %p3858_p12 = pmov %p3857_p3 }
 0x163   : > { %p2795_p5 = scmp.ne.s32.totalorder %s459_s18, %s2794_s22  ;;  %p2802_p13 = scmp.lt.s32.totalorder %s459_s18, %s459_s18 }
 0x164   : > { %p2803_p6 = scmp.lt.s32.totalorder %s2794_s22, %s2794_s22 }
 0x165   : > { %p2797_p10 = pnand %p2795_p5, %p3858_p12 }
 0x166   : > { %p2804_p4 = por %p2803_p6, %p2802_p13 }
 0x167   : > { %p2798_p1 = pneg %p2797_p10 }
 0x169   : > { %p2805_p3 = pnand %p2804_p4, %p2798_p1 }
 0x16b   : > { %2808 = shalt.err (!%p2805_p3)
}
 0x16c   : > { %2274 = dma.hbm_to_vmem [thread:$0]  (!%p3856_p0), %s3855_s25, 128, %s459_s18, [#allocation6]  }
 0x16d   : > { %s3859_s1 = sld [smem:[#allocation40_spill]]  ;;  %s675_s2 = scalar_lea.vmem [#allocation18], %s3099_s28 }
 0x16e   : > { %s682_s15 = sshll.u32 %s675_s2, 4  ;;  %p3860_p6 = scmp.ne.s32.totalorder %s3839_s27, 0  ;;  %s683_s15 = int_to_ptr.vmem [resolvable:$true] %s682_s15 }
 0x173   : > { %s3505_s3 = scalar_lea.hbm %s3859_s1, %s3201_s0  ;;  %s2814_s18 = scalar_lea.hbm %s3859_s1, 32 }
 0x174   : > { %s2809_s20 = scalar_lea.hbm %s3505_s3, 16  ;;  %p2815_p0 = scmp.lt.u32.totalorder %s3505_s3, %s3859_s1 }
 0x175   : > { %p2810_p4 = scmp.ne.s32.totalorder %s3505_s3, %s2809_s20  ;;  %p2816_p2 = scmp.lt.u32.totalorder %s2814_s18, %s2809_s20 }
 0x176   : > { %p2818_p11 = scmp.lt.u32.totalorder %s2809_s20, %s3505_s3 }
 0x177   : > { %p2812_p8 = pnand %p2810_p4, %p3860_p6  ;;  %p2817_p7 = por %p2816_p2, %p2815_p0 }
 0x179   : > { %p2813_p9 = pneg %p2812_p8  ;;  %p2819_p5 = por %p2818_p11, %p2817_p7 }
 0x17b   : > { %p2820_p12 = pnand %p2819_p5, %p2813_p9 }
 0x17d   : > { %2823 = shalt.err (!%p2820_p12)
}
 0x17e   : > { %s2824_s28 = scalar_lea.vmem %s683_s15, 16  ;;  %s2946_s0 = smov [#allocation18]  }
 0x17f   : > { %p2825_p10 = scmp.ne.s32.totalorder %s683_s15, %s2824_s28  ;;  %s2829_s13 = sshll.u32 %s2946_s0, 4  ;;  %s2830_s13 = int_to_ptr.vmem [resolvable:$false] %s2829_s13 }
 0x180   : > { %s2831_s22 = scalar_lea.vmem %s2830_s13, 32  ;;  %p2832_p3 = scmp.lt.s32.totalorder %s683_s15, %s2830_s13 }
 0x181   : > { %p2827_p1 = pnand %p2825_p10, %p3860_p6  ;;  %p2833_p4 = scmp.lt.s32.totalorder %s2831_s22, %s2824_s28 }
 0x183   : > { %p2828_p13 = pneg %p2827_p1  ;;  %p2834_p8 = por %p2833_p4, %p2832_p3 }
 0x185   : > { %p2835_p0 = pnand %p2834_p8, %p2828_p13 }
 0x187   : > { %2838 = shalt.err (!%p2835_p0)
}
 0x188   : > { %p3861_p2 = scmp.ne.s32.totalorder %s3833_s29, 0  ;;  %s3862_s24 = sld [smem:[#allocation30_spill]] }
 0x18a   : > { %2311 = dma.hbm_to_vmem [thread:$0]  (!%p3861_p2), %s3505_s3, 16, %s683_s15, %s3160_s30  }
 0x18e   : > { %p3863_p9 = scmp.ne.s32.totalorder %s3862_s24, 0 }
 0x18f   : > { %s3864_s27 = sld [smem:[#allocation28_spill]] (!%p3863_p9) }
 0x190   : > { %691 = sbr.rel (%p3863_p9) target bundleno = 3504 (0xdb0), region = 76 }
 0x195   : > { %p3865_p6 = scmp.eq.s32.totalorder (!%p3863_p9), %s3864_s27, 0 }
 0x197   : > { %2890 = dma.done.wait (%p3865_p6), [#allocation3], 256   ;;  %p3866_p7 = pmov %p3865_p6 }
 0x198   : > { %p3867_p11 = pmov %p3865_p6 }
 0x199   : > { %2892 = vsyncadd (%p3866_p7), [#allocation3], 4294967040 }
 0x19a   : > { %2894 = dma.done.wait (%p3867_p11), [#allocation6], 128   ;;  %p3868_p5 = pmov %p3865_p6 }
 0x19b   : > { %s3869_s29 = sld [smem:[#allocation24_spill]]  ;;  %s3870_s16 = sld [smem:[#allocation29_spill]] }
 0x19c   : > { %2896 = vsyncadd (%p3868_p5), [#allocation6], 4294967168  ;;  %s701_s14 = sand.u32 1, %s3864_s27  }
 0x19d   : > { %s702_s3 = scalar_lea.sflag [#allocation3], %s701_s14 }
 0x1a1   : > { %s3538_s30 = sand.u32 1, %s3869_s29   ;;  %p3871_p12 = scmp.ne.s32.totalorder %s3870_s16, 0 }
 0x1a2   : > { %s3541_s12 = sshll.u32 %s3538_s30, 4 }
 0x1a3   : > { %s705_s2 = scalar_lea.vmem [#allocation7], %s3541_s12 }
 0x1a4   : > { %2898 = dma.done.wait (%p3871_p12), %s702_s3, 1408  }
 0x1a5   : > { %2900 = vsyncadd (%p3871_p12), %s702_s3, 4294965888  ;;  %s2078_s15 = sshll.u32 %s3538_s30, 5  ;;  %s713_s20 = scalar_lea.vmem [#allocation8], %s3538_s30 }
 0x1a6   : > { %s722_s23 = scalar_lea.vmem [#allocation9], %s3541_s12  ;;  %s730_s26 = scalar_lea.vmem [#allocation10], %s3538_s30 }
 0x1a7   : > { %s739_s18 = scalar_lea.vmem [#allocation11], %s3541_s12  ;;  %s747_s4 = scalar_lea.vmem [#allocation12], %s3538_s30 }
 0x1a8   : > { %s3554_s19 = scalar_lea.vmem [#allocation13], %s2078_s15  ;;  %s764_s28 = scalar_lea.vmem [#allocation14], %s3538_s30 }
 0x1a9   : > { %s772_s0 = scalar_lea.vmem [#allocation15], %s3538_s30  ;;  %s780_s13 = scalar_lea.vmem [#allocation16], %s3538_s30 }
 0x1aa   : > { %s788_s22 = scalar_lea.vmem [#allocation17], %s3538_s30  ;;  %s796_s24 = scalar_lea.vmem [#allocation18], %s3538_s30 }
 0x1ab   : > { %s3872_s27 = sld [smem:[#allocation26_spill]] }
 0x1b1   : > { %p2079_p10 = scmp.ne.s32.totalorder %s3872_s27, 0 }
 0x1b2   : > { %v890_v0 = vld [vmem:[#allocation2] sm:$0xff] (!%p2079_p10)  ;;  %v894_v1 = vld [vmem:[#allocation5] sm:$0xff] (!%p2079_p10)  ;;  %v891_v2 = vld [vmem:[#allocation2 + $0x8] sm:$0xff] (!%p2079_p10)  ;;  %vm897_vm0 = vcmask (!%p2079_p10), 261120  }
 0x1b3   : > { %889 = sbr.rel (%p2079_p10) target bundleno = 442 (0x1ba), region = 136  ;;  %v892_v3 = vmul.f32 (!%p2079_p10), 5.656854, %v890_v0  ;;  %v893_v4 = vmul.f32 (!%p2079_p10), 5.656854, %v891_v2 }
 0x1b5   : > { %v895_v5 = vadd.f32 (!%p2079_p10), %v894_v1, %v892_v3  ;;  %v896_v6 = vadd.f32 (!%p2079_p10), %v894_v1, %v893_v4 }
 0x1b7   : > { %898 = vst.msk [vmem:[#allocation19] sm:$0xff] (!%p2079_p10), %vm897_vm0, %v895_v5  ;;  %899 = vst.msk [vmem:[#allocation19 + $0x8] sm:$0xff] (!%p2079_p10), %vm897_vm0, %v896_v6 }
 0x1ba PF: > { %v2389_v7 = vld [vmem:[%s705_s2] sm:$0xff]   ;;  %v2947_v8 = vmov 0.0   ;;  %v2390_v9 = vld [vmem:[%s705_s2 + $0x8] sm:$0xff]   ;;  %vm2948_vm1 = vmmov 0   ;;  %vm926_vm2 = vcmask 261120   ;;  %s2949_s29 = smov 96   ;;  %v971_v26 = vlaneseq }
 0x1bb   : > { %2148 = vmatprep.subr.bf16.mxu0 %v2947_v8  ;;  %2156 = vmatprep.subr.bf16.mxu1 %v2947_v8  ;;  %v2080_v13 = vld [vmem:[%s713_s20] ss:$0 sm:$0xff]  ;;  %vm981_vm3 = vcmask 130048   ;;  %vm1083_vm5 = vcmask 64512   ;;  %s2950_s16 = smov 64   ;;  %s2951_s14 = smov 80  }
 0x1bc   : > { %2149 = vmatpush3.bf16.msra.mxu0 %v2389_v7  ;;  %2152 = vmatprep.mubr.msk.bf16.mxu0 %vm2948_vm1, %v2947_v8  ;;  %v3603_v27 = vshrl.u32 %v971_v26, 7  ;;  %v3605_v28 = vand.u32 127, %v971_v26  ;;  %vm1113_vm6 = vcmask 1043456   ;;  %s2952_s3 = smov 112   ;;  %s2953_s2 = smov 48   ;;  %vm1664_vm7 = vcmask 523264  }
 0x1bd   : > { %2150 = vmatprep.subr.bf16.mxu0 %v2947_v8  ;;  %2158 = vmatprep.mubr.msk.bf16.mxu1 %vm2948_vm1, %v2947_v8  ;;  %s2954_s15 = smov 16   ;;  %s3873_s12 = sld [smem:[#allocation28_spill]] }
 0x1be   : > { %v3570_v10 = vld [vmem:[#allocation19] sm:$0xff]  ;;  %v3572_v11 = vld [vmem:[#allocation19 + $0x8] sm:$0xff]  ;;  %vm975_vm4 = vcmp.le.s32.totalorder %v3605_v28, %v3603_v27  ;;  %s2955_s20 = smov [#allocation19]  }
 0x1bf   : > { %v906_v12 = vpack.c.bf16 %v3572_v11, %v3570_v10 }
 0x1c0   : > { %2151 = vmatpush3.bf16.msra.mxu0 %v2390_v9 }
 0x1c1   : > { %2162 = vmatprep.subr.bf16.mxu0 %v2947_v8 }
 0x1c3   : > { %2153 = vmatmul.mubr.msk.bf16.vlgmr.msra.gmra.mrb[0].mxu0 %vm926_vm2, %v906_v12  ;;  %p2317_p1 = scmp.eq.s32.totalorder %s3873_s12, 1 }
 0x1c4   : > { %2164 = vmatprep.mubr.msk.bf16.mxu0 %vm2948_vm1, %v2947_v8 }
 0x296   : > { %v964_v14 = vpop.f32.mrb[0].mxu0 }
 0x297   : > { %v965_v15 = vadd.f32 %v2080_v13, %v964_v14  ;;  %v2154_v16 = vpop.f32.mrb[1].mxu0 }
 0x298   : > { %v967_v17 = vpop.f32.mrb[2].mxu0 }
 0x299   : > { %v3585_v18 = vpack.c.bf16 %v965_v15, %v965_v15  ;;  %v968_v19 = vadd.f32 %v2080_v13, %v967_v17  ;;  %v2155_v20 = vpop.f32.mrb[3].mxu0 }
 0x29b   : > { %979 = vrot.lane.b32.xlu0 %v3585_v18, %s2949_s29  ;;  %v3588_v21 = vpack.c.bf16 %v968_v19, %v968_v19 }
 0x29f   : > { %1029 = vrot.lane.b32.xlu0 %v3588_v21, %s2949_s29 }
 0x30d   : > { %v980_v22 = vpop.permute.xlu0 %979 }
 0x30e   : > { %v986_v23 = vsel %vm981_vm3, %v980_v22, 0 }
 0x30f   : > { %2157 = vmatpush3.bf16.xpose.msra.mxu1 %v986_v23 }
 0x310   : > { %2168 = vmatprep.subr.bf16.mxu1 %v2947_v8 }
 0x311   : > { %v1030_v24 = vpop.permute.xlu0 %1029 }
 0x312   : > { %v1035_v25 = vsel %vm981_vm3, %v1030_v24, 0 }
 0x313   : > { %2163 = vmatpush3.bf16.xpose.msra.mxu0 %v1035_v25 }
 0x314   : > { %2174 = vmatprep.subr.bf16.mxu0 %v2947_v8 }
 0x316   : > { %2159 = vmatmul.mubr.msk.bf16.vlgmr.msra.gmra.mrb[0].mxu1 %vm981_vm3, %v3585_v18 }
 0x317   : > { %2170 = vmatprep.mubr.msk.bf16.mxu1 %vm2948_vm1, %v2947_v8 }
 0x31a   : > { %2165 = vmatmul.mubr.msk.bf16.vlgmr.msra.gmra.mrb[4].mxu0 %vm981_vm3, %v3588_v21 }
 0x31b   : > { %2176 = vmatprep.mubr.msk.bf16.mxu0 %vm2948_vm1, %v2947_v8 }
 0x3e9   : > { %v1022_v29 = vpop.f32.mrb[0].mxu1 }
 0x3ea   : > { %v1077_v30 = vmul.f32 0.25, %v1022_v29  ;;  %v2160_v31 = vpop.f32.mrb[1].mxu1 }
 0x3eb   : > { %v1025_v32 = vpop.f32.mrb[2].mxu1 }
 0x3ec   : > { %v2161_v33 = vpop.f32.mrb[3].mxu1  ;;  %v1081_v34 = vsel %vm975_vm4, %v1077_v30, -1e+30 }
 0x3ed   : > { %v1071_v35 = vpop.f32.mrb[4].mxu0  ;;  %v1084_v36 = vsel %vm1083_vm5, %v1081_v34, -inf }
 0x3ee   : > { %v1078_v37 = vmul.f32 0.25, %v1071_v35  ;;  %1085 = vmax.xlane.f32.xlu1 %v1084_v36  ;;  %v2166_v38 = vpop.f32.mrb[5].mxu0 }
 0x3ef   : > { %v1074_v39 = vpop.f32.mrb[6].mxu0 }
 0x3f0   : > { %v2167_v40 = vpop.f32.mrb[7].mxu0  ;;  %v1082_v41 = vsel %vm975_vm4, %v1078_v37, -1e+30 }
 0x3f1   : > { %v1087_v42 = vsel %vm1083_vm5, %v1082_v41, -inf }
 0x3f2   : > { %1088 = vmax.xlane.f32.xlu1 %v1087_v42 }
 0x403   : > { %1108 = vrot.lane.b32.xlu1 %v3585_v18, %s2950_s16 }
 0x407   : > { %1157 = vrot.lane.b32.xlu1 %v3588_v21, %s2950_s16 }
 0x40b   : > { %1207 = vrot.lane.b32.xlu1 %v3585_v18, %s2951_s14 }
 0x47b   : > { %v1086_v43 = vpop.xlane.xlu1 %1085 }
 0x47c   : > { %v1090_v44 = vsub.f32 %v1081_v34, %v1086_v43 }
 0x47e   : > { %v1092_v45 = vmul.f32 1.442695, %v1090_v44 }
 0x47f   : > { %v1089_v46 = vpop.xlane.xlu1 %1088 }
 0x480   : > { %2399 = vpow2.f32 %v1092_v45  ;;  %v1091_v47 = vsub.f32 %v1082_v41, %v1089_v46 }
 0x482   : > { %v1094_v48 = vmul.f32 1.442695, %v1091_v47 }
 0x483   : > { %v1109_v49 = vpop.permute.xlu1 %1108 }
 0x484   : > { %2401 = vpow2.f32 %v1094_v48  ;;  %v1115_v50 = vsel %vm1113_vm6, %v1109_v49, 0 }
 0x485   : > { %2169 = vmatpush3.bf16.msra.mxu1 %v1115_v50 }
 0x486   : > { %2180 = vmatprep.subr.bf16.mxu1 %v2947_v8 }
 0x487   : > { %v1158_v51 = vpop.permute.xlu1 %1157 }
 0x488   : > { %v1163_v52 = vsel %vm1113_vm6, %v1158_v51, 0 }
 0x489   : > { %2175 = vmatpush3.bf16.msra.mxu0 %v1163_v52 }
 0x48a   : > { %v2400_v53 = vpop.eup %2399  ;;  %2186 = vmatprep.subr.bf16.mxu0 %v2947_v8 }
 0x48b   : > { %v1096_v54 = vsel %vm1083_vm5, %v2400_v53, 0.0  ;;  %v1208_v57 = vpop.permute.xlu1 %1207 }
 0x48c   : > { %1097 = vadd.xlane.f32.xlu0 %v1096_v54  ;;  %v1213_v0 = vsel %vm981_vm3, %v1208_v57, 0  ;;  %v2391_v54 = vld [vmem:[%s722_s23] sm:$0xff]  }
 0x48e   : > { %v2402_v55 = vpop.eup %2401 }
 0x48f   : > { %v1099_v56 = vsel %vm1083_vm5, %v2402_v55, 0.0 }
 0x490   : > { %1100 = vadd.xlane.f32.xlu1 %v1099_v56 }
 0x4a1   : > { %1257 = vrot.lane.b32.xlu1 %v3588_v21, %s2951_s14 }
 0x4a2   : > { %1205 = vrot.lane.b32.xlu0 %v3585_v18, %s2952_s3 }
 0x4a5   : > { %1255 = vrot.lane.b32.xlu1 %v3588_v21, %s2952_s3 }
 0x519   : > { %v1098_v58 = vpop.xlane.xlu0 %1097 }
 0x51a   : > { %2403 = vrcp.f32 %v1098_v58 }
 0x51d   : > { %v1101_v59 = vpop.xlane.xlu1 %1100  ;;  %v1206_v5 = vpop.permute.xlu0 %1205 }
 0x51e   : > { %2405 = vrcp.f32 %v1101_v59 }
 0x521   : > { %v1258_v2 = vpop.permute.xlu1 %1257 }
 0x522   : > { %v1263_v4 = vsel %vm981_vm3, %v1258_v2, 0 }
 0x524   : > { %v2404_v60 = vpop.eup %2403 }
 0x525   : > { %v1104_v61 = vmul.f32 %v2404_v60, %v2400_v53  ;;  %v1256_v6 = vpop.permute.xlu1 %1255 }
 0x527   : > { %v1106_v62 = vpack.c.bf16 %v1104_v61, %v1104_v61 }
 0x528   : > { %v2406_v63 = vpop.eup %2405 }
 0x529   : > { %v1105_v1 = vmul.f32 %v2406_v63, %v2402_v55  ;;  %2171 = vmatmul.mubr.msk.bf16.vlgmr.msra.gmra.mrb[4].mxu1 %vm1083_vm5, %v1106_v62  ;;  %v2392_v55 = vld [vmem:[%s722_s23 + $0x8] sm:$0xff]   ;;  %s1766_s23 = sshll.u32 %s2955_s20, 4  ;;  %s1767_s23 = int_to_ptr.vmem [resolvable:$true] %s1766_s23 }
 0x52a   : > { %2181 = vmatpush3.bf16.xpose.msra.mxu1 %v1213_v0  ;;  %2182 = vmatprep.mubr.msk.bf16.mxu1 %vm2948_vm1, %v2947_v8  ;;  %p2846_p8 = scmp.lt.s32.totalorder %s1767_s23, %s1767_s23 }
 0x52b   : > { %v1107_v3 = vpack.c.bf16 %v1105_v1, %v1105_v1  ;;  %2192 = vmatprep.subr.bf16.mxu1 %v2947_v8 }
 0x52d   : > { %2177 = vmatmul.mubr.msk.bf16.vlgmr.msra.gmra.mrb[8].mxu0 %vm1083_vm5, %v1107_v3 }
 0x52e   : > { %2187 = vmatpush3.bf16.xpose.msra.mxu0 %v1263_v4  ;;  %2188 = vmatprep.mubr.msk.bf16.mxu0 %vm2948_vm1, %v2947_v8 }
 0x52f   : > { %2198 = vmatprep.subr.bf16.mxu0 %v2947_v8 }
 0x531   : > { %2183 = vmatmul.mubr.msk.bf16.vlgmr.msra.gmra.mrb[8].mxu1 %vm981_vm3, %v1206_v5 }
 0x532   : > { %2194 = vmatprep.mubr.msk.bf16.mxu1 %vm2948_vm1, %v2947_v8 }
 0x535   : > { %2189 = vmatmul.mubr.msk.bf16.vlgmr.msra.gmra.mrb[12].mxu0 %vm981_vm3, %v1256_v6 }
 0x536   : > { %2200 = vmatprep.mubr.msk.bf16.mxu0 %vm2948_vm1, %v2947_v8 }
 0x5fc   : > { %v3645_v7 = vpop.f32.mrb[4].mxu1 }
 0x5fd   : > { %v2172_v9 = vpop.f32.mrb[5].mxu1 }
 0x5fe   : > { %v1154_v12 = vpop.f32.mrb[6].mxu1  ;;  %v2092_v9 = vld [vmem:[%s730_s26] ss:$0 sm:$0xff]  ;;  %s2839_s26 = scalar_lea.vmem %s1767_s23, 256 }
 0x5ff   : > { %v2173_v13 = vpop.f32.mrb[7].mxu1  ;;  %p2840_p13 = scmp.ne.s32.totalorder %s1767_s23, %s2839_s26  ;;  %p2847_p0 = scmp.lt.s32.totalorder %s2839_s26, %s2839_s26 }
 0x600   : > { %v3647_v14 = vpop.f32.mrb[8].mxu0 }
 0x601   : > { %v2178_v15 = vpop.f32.mrb[9].mxu0  ;;  %p2841_p3 = pnand %p2840_p13, %p2317_p1  ;;  %p2848_p2 = por %p2847_p0, %p2846_p8 }
 0x602   : > { %v1202_v16 = vpop.f32.mrb[10].mxu0 }
 0x603   : > { %v2179_v17 = vpop.f32.mrb[11].mxu0  ;;  %p2842_p4 = pneg %p2841_p3 }
 0x604   : > { %v1249_v19 = vpop.f32.mrb[8].mxu1 }
 0x605   : > { %v1305_v20 = vmul.f32 0.25, %v1249_v19  ;;  %v2184_v22 = vpop.f32.mrb[9].mxu1  ;;  %p2849_p9 = pnand %p2848_p2, %p2842_p4 }
 0x606   : > { %v1252_v23 = vpop.f32.mrb[10].mxu1 }
 0x607   : > { %v2185_v24 = vpop.f32.mrb[11].mxu1  ;;  %v1307_v25 = vsel %vm975_vm4, %v1305_v20, -1e+30 }
 0x608   : > { %v1299_v26 = vpop.f32.mrb[12].mxu0  ;;  %v1309_v29 = vsel %vm1083_vm5, %v1307_v25, -inf }
 0x609   : > { %v1306_v30 = vmul.f32 0.25, %v1299_v26  ;;  %1310 = vmax.xlane.f32.xlu1 %v1309_v29  ;;  %v2190_v31 = vpop.f32.mrb[13].mxu0 }
 0x60a   : > { %v1302_v32 = vpop.f32.mrb[14].mxu0 }
 0x60b   : > { %v2191_v33 = vpop.f32.mrb[15].mxu0  ;;  %v1308_v34 = vsel %vm975_vm4, %v1306_v30, -1e+30 }
 0x60c   : > { %v1312_v35 = vsel %vm1083_vm5, %v1308_v34, -inf  ;;  %v2393_v33 = vld [vmem:[%s739_s18] sm:$0xff]  }
 0x60d   : > { %1313 = vmax.xlane.f32.xlu0 %v1312_v35  ;;  %v2395_v35 = vld [vmem:[%s3554_s19] sm:$0xff]  }
 0x623   : > { %1381 = vrot.lane.b32.xlu0 %v3588_v21, %s2953_s2 }
 0x696   : > { %v1311_v36 = vpop.xlane.xlu1 %1310 }
 0x697   : > { %v1315_v37 = vsub.f32 %v1307_v25, %v1311_v36  ;;  %v2396_v36 = vld [vmem:[%s3554_s19 + $0x8] sm:$0xff]  }
 0x699   : > { %v1317_v38 = vmul.f32 1.442695, %v1315_v37 }
 0x69a   : > { %v1314_v39 = vpop.xlane.xlu0 %1313 }
 0x69b   : > { %2407 = vpow2.f32 %v1317_v38  ;;  %v1316_v40 = vsub.f32 %v1308_v34, %v1314_v39  ;;  %v2394_v34 = vld [vmem:[%s739_s18 + $0x8] sm:$0xff]  }
 0x69d   : > { %v1319_v41 = vmul.f32 1.442695, %v1316_v40 }
 0x69e   : > { %v1382_v42 = vpop.permute.xlu0 %1381 }
 0x69f   : > { %2409 = vpow2.f32 %v1319_v41  ;;  %v1387_v43 = vsel %vm1113_vm6, %v1382_v42, 0 }
 0x6a0   : > { %2199 = vmatpush3.bf16.msra.mxu0 %v1387_v43 }
 0x6a1   : > { %2212 = vmatprep.subr.bf16.mxu0 %v2947_v8 }
 0x6a5   : > { %v2408_v27 = vpop.eup %2407 }
 0x6a6   : > { %v1321_v28 = vsel %vm1083_vm5, %v2408_v27, 0.0 }
 0x6a7   : > { %1322 = vadd.xlane.f32.xlu1 %v1321_v28 }
 0x6a9   : > { %v2410_v44 = vpop.eup %2409 }
 0x6aa   : > { %v1324_v21 = vsel %vm1083_vm5, %v2410_v44, 0.0 }
 0x6ab   : > { %1325 = vadd.xlane.f32.xlu1 %v1324_v21 }
 0x6bc   : > { %1333 = vrot.lane.b32.xlu1 %v3585_v18, %s2953_s2 }
 0x734   : > { %v1323_v45 = vpop.xlane.xlu1 %1322 }
 0x735   : > { %2411 = vrcp.f32 %v1323_v45 }
 0x738   : > { %v1326_v46 = vpop.xlane.xlu1 %1325 }
 0x739   : > { %2413 = vrcp.f32 %v1326_v46  ;;  %v2097_v46 = vld [vmem:[%s780_s13] ss:$0 sm:$0xff] }
 0x73c   : > { %v1334_v47 = vpop.permute.xlu1 %1333 }
 0x73d   : > { %v1339_v48 = vsel %vm1113_vm6, %v1334_v47, 0 }
 0x73e   : > { %2193 = vmatpush3.bf16.msra.mxu1 %v1339_v48 }
 0x73f   : > { %v2412_v49 = vpop.eup %2411  ;;  %2204 = vmatprep.subr.bf16.mxu1 %v2947_v8 }
 0x740   : > { %v1329_v50 = vmul.f32 %v2412_v49, %v2408_v27  ;;  %v2096_v27 = vld [vmem:[%s772_s0] ss:$0 sm:$0xff] }
 0x742   : > { %v1331_v51 = vpack.c.bf16 %v1329_v50, %v1329_v50 }
 0x743   : > { %v2414_v52 = vpop.eup %2413 }
 0x744   : > { %v1330_v53 = vmul.f32 %v2414_v52, %v2410_v44  ;;  %2195 = vmatmul.mubr.msk.bf16.vlgmr.msra.gmra.mrb[12].mxu1 %vm1083_vm5, %v1331_v51  ;;  %v2397_v51 = vld [vmem:[%s3554_s19 + $0x10] sm:$0xff]   ;;  %v2398_v52 = vld [vmem:[%s3554_s19 + $0x18] sm:$0xff]  }
 0x745   : > { %2208 = vmatprep.mubr.msk.bf16.mxu1 %vm2948_vm1, %v2947_v8  ;;  %2205 = vmatpush3.bf16.msra.mxu1 %v2391_v54 }
 0x746   : > { %v1332_v18 = vpack.c.bf16 %v1330_v53, %v1330_v53  ;;  %2206 = vmatprep.subr.bf16.mxu1 %v2947_v8  ;;  %v2098_v53 = vld [vmem:[%s747_s4] ss:$0 sm:$0xff] }
 0x748   : > { %2201 = vmatmul.mubr.msk.bf16.vlgmr.msra.gmra.mrb[16].mxu0 %vm1083_vm5, %v1332_v18 }
 0x749   : > { %2216 = vmatprep.mubr.msk.bf16.mxu0 %vm2948_vm1, %v2947_v8  ;;  %2207 = vmatpush3.bf16.msra.mxu1 %v2392_v55 }
 0x74a   : > { %2220 = vmatprep.subr.bf16.mxu1 %v2947_v8  ;;  %2213 = vmatpush3.bf16.msra.mxu0 %v2393_v33  ;;  %v2109_v33 = vld [vmem:[%s796_s24] ss:$0 sm:$0xff] }
 0x74b   : > { %2214 = vmatprep.subr.bf16.mxu0 %v2947_v8 }
 0x74e   : > { %2215 = vmatpush3.bf16.msra.mxu0 %v2394_v34 }
 0x817   : > { %v1375_v56 = vpop.f32.mrb[12].mxu1 }
 0x818   : > { %v2196_v57 = vpop.f32.mrb[13].mxu1 }
 0x819   : > { %v1378_v58 = vpop.f32.mrb[14].mxu1 }
 0x81a   : > { %v2197_v59 = vpop.f32.mrb[15].mxu1 }
 0x81b   : > { %v1423_v60 = vpop.f32.mrb[16].mxu0 }
 0x81c   : > { %v2384_v61 = vpack.i.bf16 %v1423_v60, %v1375_v56  ;;  %v2202_v62 = vpop.f32.mrb[17].mxu0 }
 0x81d   : > { %v1426_v63 = vpop.f32.mrb[18].mxu0  ;;  %v2102_v62 = vld [vmem:[%s764_s28] ss:$0 sm:$0xff] }
 0x81e   : > { %2385 = vrot.lane.b32.xlu1 %v2384_v61, %s2954_s15  ;;  %v2203_v0 = vpop.f32.mrb[19].mxu0 }
 0x890   : > { %v2386_v1 = vpop.permute.xlu1 %2385 }
 0x891   : > { %v2388_v2 = vunpack.i.h.bf16 %v2386_v1  ;;  %v2387_v3 = vunpack.i.l.bf16 %v2386_v1 }
 0x893   : > { %v1438_v4 = vsel %vm981_vm3, %v3647_v14, %v2388_v2  ;;  %v1437_v5 = vsel %vm981_vm3, %v3645_v7, %v2387_v3 }
 0x894   : > { %v1443_v6 = vpack.c.bf16 %v1438_v4, %v1437_v5 }
 0x896   : > { %2209 = vmatmul.mubr.msk.bf16.vlgmr.msra.gmra.mrb[16].mxu1 %vm926_vm2, %v1443_v6 }
 0x897   : > { %2228 = vmatprep.mubr.msk.bf16.mxu1 %vm2948_vm1, %v2947_v8  ;;  %2221 = vmatpush3.bf16.msra.mxu1 %v2395_v35 }
 0x898   : > { %2222 = vmatprep.subr.bf16.mxu1 %v2947_v8 }
 0x89b   : > { %2223 = vmatpush3.bf16.msra.mxu1 %v2396_v36 }
 0x89c   : > { %2224 = vmatprep.subr.bf16.mxu1 %v2947_v8 }
 0x89f   : > { %2225 = vmatpush3.bf16.msra.mxu1 %v2397_v51 }
 0x8a0   : > { %2226 = vmatprep.subr.bf16.mxu1 %v2947_v8 }
 0x8a3   : > { %2227 = vmatpush3.bf16.msra.mxu1 %v2398_v52 }
 0x969   : > { %v1500_v12 = vpop.f32.mrb[16].mxu1 }
 0x96a   : > { %v1501_v13 = vadd.f32 %v2092_v9, %v1500_v12  ;;  %v2210_v15 = vpop.f32.mrb[17].mxu1 }
 0x96b   : > { %v1503_v16 = vpop.f32.mrb[18].mxu1 }
 0x96c   : > { %v1504_v17 = vadd.f32 %v2092_v9, %v1503_v16  ;;  %v2211_v19 = vpop.f32.mrb[19].mxu1  ;;  %v1507_v20 = vadd.f32 %v1501_v13, %v3570_v10 }
 0x96e   : > { %v1511_v14 = vsel %vm926_vm2, %v1507_v20, 0.0  ;;  %v1508_v7 = vadd.f32 %v1504_v17, %v3572_v11 }
 0x96f   : > { %1512 = vadd.xlane.f32.xlu1 %v1511_v14 }
 0x970   : > { %v1514_v22 = vsel %vm926_vm2, %v1508_v7, 0.0 }
 0x971   : > { %1515 = vadd.xlane.f32.xlu0 %v1514_v22 }
 0x9fc   : > { %v1513_v23 = vpop.xlane.xlu1 %1512 }
 0x9fd   : > { %v1518_v24 = vmul.f32 0.03125, %v1513_v23 }
 0x9fe   : > { %v1516_v25 = vpop.xlane.xlu0 %1515 }
 0x9ff   : > { %v1520_v26 = vsub.f32 %v1507_v20, %v1518_v24  ;;  %v1519_v29 = vmul.f32 0.03125, %v1516_v25 }
 0xa01   : > { %v1521_v30 = vsub.f32 %v1508_v7, %v1519_v29  ;;  %v1522_v31 = vmul.f32 %v1520_v26, %v1520_v26 }
 0xa03   : > { %v1524_v10 = vsel %vm926_vm2, %v1522_v31, 0.0  ;;  %v1523_v32 = vmul.f32 %v1521_v30, %v1521_v30 }
 0xa04   : > { %1525 = vadd.xlane.f32.xlu0 %v1524_v10  ;;  %v2108_v10 = vld [vmem:[%s788_s22] ss:$0 sm:$0xff] }
 0xa05   : > { %v1527_v11 = vsel %vm926_vm2, %v1523_v32, 0.0 }
 0xa06   : > { %1528 = vadd.xlane.f32.xlu1 %v1527_v11 }
 0xa91   : > { %v1526_v37 = vpop.xlane.xlu0 %1525 }
 0xa92   : > { %v1530_v38 = vmul.f32 0.03125, %v1526_v37 }
 0xa93   : > { %v1529_v39 = vpop.xlane.xlu1 %1528 }
 0xa94   : > { %v1532_v40 = vadd.f32 1e-05, %v1530_v38  ;;  %v1531_v41 = vmul.f32 0.03125, %v1529_v39 }
 0xa96   : > { %2415 = vrsqrt.f32 %v1532_v40  ;;  %v1533_v42 = vadd.f32 1e-05, %v1531_v41 }
 0xa98   : > { %2417 = vrsqrt.f32 %v1533_v42 }
 0xaa0   : > { %v2416_v43 = vpop.eup %2415 }
 0xaa1   : > { %v1536_v28 = vmul.f32 %v2416_v43, %v1520_v26 }
 0xaa2   : > { %v2418_v44 = vpop.eup %2417 }
 0xaa3   : > { %v1544_v21 = vmul.f32 %v2096_v27, %v1536_v28  ;;  %v1537_v45 = vmul.f32 %v2418_v44, %v1521_v30 }
 0xaa5   : > { %v1545_v47 = vmul.f32 %v2096_v27, %v1537_v45  ;;  %v1552_v48 = vadd.f32 %v2097_v46, %v1544_v21 }
 0xaa7   : > { %v1553_v49 = vadd.f32 %v2097_v46, %v1545_v47 }
 0xaa9   : > { %v1558_v50 = vpack.c.bf16 %v1553_v49, %v1552_v48 }
 0xaab   : > { %2217 = vmatmul.mubr.msk.bf16.vlgmr.msra.gmra.mrb[20].mxu0 %vm926_vm2, %v1558_v50 }
 0xb7e   : > { %v1615_v18 = vpop.f32.mrb[20].mxu0 }
 0xb7f   : > { %v1616_v54 = vadd.f32 %v2098_v53, %v1615_v18  ;;  %v2218_v55 = vpop.f32.mrb[21].mxu0 }
 0xb80   : > { %v1618_v56 = vpop.f32.mrb[22].mxu0 }
 0xb81   : > { %v1619_v57 = vadd.f32 %v2098_v53, %v1618_v56  ;;  %v2219_v58 = vpop.f32.mrb[23].mxu0  ;;  %v1622_v59 = vmax.f32 %v1616_v54, 0.0 }
 0xb83   : > { %v1623_v60 = vmax.f32 %v1619_v57, 0.0 }
 0xb85   : > { %v1632_v61 = vpack.c.bf16 %v1623_v60, %v1622_v59 }
 0xb87   : > { %2229 = vmatmul.mubr.msk.bf16.vlgmr.msra.gmra.mrb[20].mxu1 %vm1664_vm7, %v1632_v61 }
 0xc5a   : > { %v1702_v63 = vpop.f32.mrb[20].mxu1 }
 0xc5b   : > { %v1703_v0 = vadd.f32 %v2102_v62, %v1702_v63  ;;  %v2230_v8 = vpop.f32.mrb[21].mxu1 }
 0xc5c   : > { %v1705_v1 = vpop.f32.mrb[22].mxu1 }
 0xc5d   : > { %v1706_v2 = vadd.f32 %v2102_v62, %v1705_v1  ;;  %v2231_v3 = vpop.f32.mrb[23].mxu1  ;;  %v1709_v4 = vadd.f32 %v1703_v0, %v1552_v48 }
 0xc5f   : > { %v1713_v5 = vsel %vm926_vm2, %v1709_v4, 0.0  ;;  %v1710_v6 = vadd.f32 %v1706_v2, %v1553_v49 }
 0xc60   : > { %1714 = vadd.xlane.f32.xlu0 %v1713_v5 }
 0xc61   : > { %v1716_v9 = vsel %vm926_vm2, %v1710_v6, 0.0 }
 0xc62   : > { %1717 = vadd.xlane.f32.xlu1 %v1716_v9 }
 0xced   : > { %v1715_v12 = vpop.xlane.xlu0 %1714 }
 0xcee   : > { %v1719_v13 = vmul.f32 0.03125, %v1715_v12 }
 0xcef   : > { %v1718_v15 = vpop.xlane.xlu1 %1717 }
 0xcf0   : > { %v1721_v16 = vsub.f32 %v1709_v4, %v1719_v13  ;;  %v1720_v17 = vmul.f32 0.03125, %v1718_v15 }
 0xcf2   : > { %v1722_v19 = vsub.f32 %v1710_v6, %v1720_v17  ;;  %v1723_v20 = vmul.f32 %v1721_v16, %v1721_v16 }
 0xcf4   : > { %v1725_v14 = vsel %vm926_vm2, %v1723_v20, 0.0  ;;  %v1724_v7 = vmul.f32 %v1722_v19, %v1722_v19 }
 0xcf5   : > { %1726 = vadd.xlane.f32.xlu0 %v1725_v14 }
 0xcf6   : > { %v1728_v22 = vsel %vm926_vm2, %v1724_v7, 0.0 }
 0xcf7   : > { %1729 = vadd.xlane.f32.xlu1 %v1728_v22 }
 0xd82   : > { %v1727_v23 = vpop.xlane.xlu0 %1726 }
 0xd83   : > { %v1731_v24 = vmul.f32 0.03125, %v1727_v23 }
 0xd84   : > { %v1730_v25 = vpop.xlane.xlu1 %1729 }
 0xd85   : > { %v1733_v26 = vadd.f32 1e-05, %v1731_v24  ;;  %v1732_v29 = vmul.f32 0.03125, %v1730_v25 }
 0xd87   : > { %2419 = vrsqrt.f32 %v1733_v26  ;;  %v1734_v30 = vadd.f32 1e-05, %v1732_v29 }
 0xd89   : > { %2421 = vrsqrt.f32 %v1734_v30 }
 0xd91   : > { %v2420_v31 = vpop.eup %2419 }
 0xd92   : > { %v1737_v32 = vmul.f32 %v2420_v31, %v1721_v16 }
 0xd93   : > { %v2422_v11 = vpop.eup %2421 }
 0xd94   : > { %v1745_v34 = vmul.f32 %v2108_v10, %v1737_v32  ;;  %v1738_v35 = vmul.f32 %v2422_v11, %v1722_v19 }
 0xd96   : > { %v1746_v36 = vmul.f32 %v2108_v10, %v1738_v35  ;;  %v1753_v37 = vadd.f32 %v2109_v33, %v1745_v34 }
 0xd98   : > { %v1754_v38 = vadd.f32 %v2109_v33, %v1746_v36  ;;  %1755 = vst.msk [vmem:[#allocation19] sm:$0xff] %vm926_vm2, %v1753_v37 }
 0xd9a   : > { %1756 = vst.msk [vmem:[#allocation19 + $0x8] sm:$0xff] %vm926_vm2, %v1754_v38 }
 0xd9b   : > { %2852 = shalt.err (!%p2849_p9)
}
 0xd9c   : > { %s3874_s4 = sld [smem:[#allocation41_spill]] }
 0xda2   : > { %s2853_s19 = scalar_lea.hbm %s3874_s4, 256 }
 0xda3   : > { %p2854_p6 = scmp.ne.s32.totalorder %s3874_s4, %s2853_s19  ;;  %p2859_p5 = scmp.lt.u32.totalorder %s2853_s19, %s3874_s4 }
 0xda5   : > { %p2855_p7 = pnand %p2854_p6, %p2317_p1 }
 0xda7   : > { %p2856_p11 = pneg %p2855_p7 }
 0xda9   : > { %p2861_p12 = pnand %p2859_p5, %p2856_p11 }
 0xdab   : > { %2864 = shalt.err (!%p2861_p12)
}
 0xdac   : > { %s2956_s24 = smov 128   ;;  %s2957_s27 = smov 8  }
 0xdad   : > { %2265 = dma.vmem_to_hbm [thread:$0]  (%p2317_p1), %s1767_s23, 256, %s3874_s4, [#allocation4], %s2956_s24, %s2956_s24, %s2957_s27  }
 0xdae   : > { %2902 = dma.done.wait (%p2317_p1), [#allocation4], 256  }
 0xdaf   : > { %2904 = vsyncadd (%p2317_p1), [#allocation4], 4294967040 }
 0xdb0 PF: > { %s3875_s14 = sld [smem:[#allocation27_spill]]  ;;  %s3876_s29 = sld [smem:[#allocation24_spill]] }
 0xdb1   : > { %s3877_s30 = sld [smem:[#allocation25_spill]]  ;;  %s3878_s15 = sld [smem:[#allocation33_spill]] }
 0xdb2   : > { %s3879_s3 = sld [smem:[#allocation32_spill]]  ;;  %s3880_s16 = smov %s2923_s17 }
 0xdb6   : > { %s27_s18 = sadd.s32 1, %s3875_s14  }
 0xdb7   : > { %p24_p10 = scmp.ge.s32.totalorder %s27_s18, 4  }
 0xdb8   : > { %s3881_s17 = smov %s3879_s3 }
 0xdb9   :  { %26 = sbr.rel (!%p24_p10) target bundleno = 14 (0xe), region = 247 }
 0xdc0   :  { %1782 = vsyncpa [#allocation3], 1 }
 0xdc1   :  { %1784 = vsyncpa [#allocation3 + $0x1], 1 }
 0xdc2   :  { %1785 = vsyncpa [#allocation6], 1 }
 0xdc3   :  { %1786 = vsyncpa [#allocation4], 1 }
 0xdc4   :  { %1788 = vsyncpa [#allocation4 + $0x1], 1 }

</bundles_post_ra>
